<compile_context>
chip_gen: v7x
topology: tpu7x:2x2x1
jax: 0.10.0
libtpu: 0.0.40
codegen_flags: <defaults>
</compile_context>

<pallas_src>
import functools

import jax
import jax.numpy as jnp
from jax import lax
from jax.experimental import pallas as pl
from jax.experimental.pallas import tpu as pltpu

_PAD_COL0 = 8   # sublane-aligned column where the pad-scratch interior starts


def _bottleneck_kernel(*refs, stride, has_shortcut, spatial):
    """Nb batch elements per grid step. Everything stays in VMEM."""
    if has_shortcut:
        (x_ref, w1_ref, w2_ref, w3_ref, wsc_ref,
         b1_ref, b2_ref, b3_ref, bsc_ref, o_ref, pad_ref, im2_ref) = refs
    else:
        (x_ref, w1_ref, w2_ref, w3_ref,
         b1_ref, b2_ref, b3_ref, o_ref, pad_ref, im2_ref) = refs
        wsc_ref = bsc_ref = None

    H, W, Ho, Wo = spatial
    nb, _, Cin = x_ref.shape
    Cout = o_ref.shape[2]
    P = w1_ref.shape[1]
    bf16 = jnp.bfloat16
    C0 = _PAD_COL0

    # ---- zero only the 1-pixel border cells that conv2 actually reads -------
    # (the interior is fully overwritten below on every grid step, so no
    #  reliance on scratch persistence / which core runs which batch element)
    zrow = jnp.zeros((nb, 1, W + 2, P), bf16)
    pad_ref[:, 0:1, C0 - 1:C0 + W + 1, :] = zrow
    pad_ref[:, H + 1:H + 2, C0 - 1:C0 + W + 1, :] = zrow
    zcol = jnp.zeros((nb, H, 1, P), bf16)
    pad_ref[:, 1:H + 1, C0 - 1:C0, :] = zcol
    pad_ref[:, 1:H + 1, C0 + W:C0 + W + 1, :] = zcol

    x = x_ref[...]                                       # (nb, H*W, Cin) bf16
    xf = x.reshape(nb * H * W, Cin)

    # ---- conv1 (1x1, BN folded) + bias + relu, stored bf16 into pad interior -
    h1 = jnp.dot(xf, w1_ref[...], preferred_element_type=jnp.float32)
    h1 = jnp.maximum(h1 + b1_ref[...], 0.0).astype(bf16)  # (nb*H*W, P)
    pad_ref[:, 1:H + 1, C0:C0 + W, :] = h1.reshape(nb, H, W, P)

    # ---- conv2 (3x3, stride, pad=1): bf16 im2col assembled tap-by-tap -------
    if stride == 1:
        for dy in range(3):
            for dx in range(3):
                t = 3 * dy + dx
                tap = pad_ref[:, pl.ds(dy, Ho), pl.ds(C0 - 1 + dx, Wo), :]
                im2_ref[:, :, :, t * P:(t + 1) * P] = tap
    else:
        padded = pad_ref[...]
        for dy in range(3):
            for dx in range(3):
                t = 3 * dy + dx
                tap = lax.slice(
                    padded, (0, dy, C0 - 1 + dx, 0),
                    (nb, dy + (Ho - 1) * stride + 1,
                     C0 - 1 + dx + (Wo - 1) * stride + 1, P),
                    (1, stride, stride, 1))
                im2_ref[:, :, :, t * P:(t + 1) * P] = tap

    im2 = im2_ref[...].reshape(nb * Ho * Wo, 9 * P)        # bf16, K = 9*P
    h2 = jnp.dot(im2, w2_ref[...], preferred_element_type=jnp.float32)
    h2 = jnp.maximum(h2 + b2_ref[...], 0.0)                # (nb*Ho*Wo, P) f32

    # ---- conv3 (1x1) + bias --------------------------------------------------
    h3 = jnp.dot(h2.astype(bf16), w3_ref[...],
                 preferred_element_type=jnp.float32)
    h3 = h3 + b3_ref[...]                                  # (nb*Ho*Wo, Cout) f32

    # ---- shortcut ------------------------------------------------------------
    if has_shortcut:
        if stride == 1:
            xs = xf
        else:
            xs = lax.slice(x.reshape(nb, H, W, Cin), (0, 0, 0, 0),
                           (nb, (Ho - 1) * stride + 1,
                            (Wo - 1) * stride + 1, Cin),
                           (1, stride, stride, 1)).reshape(nb * Ho * Wo, Cin)
        sc = jnp.dot(xs, wsc_ref[...], preferred_element_type=jnp.float32)
        sc = sc + bsc_ref[...]
    else:
        # identity shortcut (stride=1, Cin==Cout); residual uses the bf16 view
        # of x (within tolerance vs the f32 PyTorch residual path).
        sc = xf.astype(jnp.float32)

    # ---- add + relu + store (bf16, lane-dense) -------------------------------
    out = jnp.maximum(h3 + sc, 0.0)
    o_ref[...] = out.reshape(nb, Ho * Wo, Cout).astype(o_ref.dtype)


def _pick_nb(N, Ho, Wo, target_rows=512):
    """Images per grid step: fill the MXU rows, keep >=2 grid steps if possible."""
    nb = max(1, min(N, (target_rows + Ho * Wo - 1) // (Ho * Wo)))
    while N % nb:
        nb -= 1
    while nb > 1 and N // nb < 2:     # keep both v7x TCs busy / pipeline alive
        nb -= 1
        while N % nb:
            nb -= 1
    return nb


def bottleneck_forward(x_nchw, params, *, stride=1):
    """x_nchw: (N, Cin, H, W) float32.  Returns (N, 4*planes, Ho, Wo) float32."""
    N, Cin, H, W = x_nchw.shape
    P = params['w1f'].shape[1]             # planes
    Cout = params['w3f'].shape[1]          # 4 * planes
    Ho = (H - 1) // stride + 1
    Wo = (W - 1) // stride + 1
    has_shortcut = params['has_shortcut']
    if not has_shortcut:
        assert stride == 1 and Cin == Cout, "identity shortcut needs stride=1 and Cin==Cout"

    nb = _pick_nb(N, Ho, Wo)

    # glue: NCHW -> NHWC -> (N, H*W, C) flat, bf16 (halves input DMA; no
    # in-kernel input relayout).
    x_flat = jnp.transpose(x_nchw, (0, 2, 3, 1)).reshape(N, H * W, Cin)
    x_flat = x_flat.astype(jnp.bfloat16)

    kernel = functools.partial(_bottleneck_kernel, stride=stride,
                               has_shortcut=has_shortcut,
                               spatial=(H, W, Ho, Wo))

    in_specs = [
        pl.BlockSpec((nb, H * W, Cin), lambda n: (n, 0, 0)),
        pl.BlockSpec((Cin, P), lambda n: (0, 0)),
        pl.BlockSpec((9 * P, P), lambda n: (0, 0)),
        pl.BlockSpec((P, Cout), lambda n: (0, 0)),
    ]
    args = [x_flat, params['w1f'], params['w2f'], params['w3f']]
    if has_shortcut:
        in_specs.append(pl.BlockSpec((Cin, Cout), lambda n: (0, 0)))
        args.append(params['wscf'])
    in_specs += [
        pl.BlockSpec((1, P), lambda n: (0, 0)),
        pl.BlockSpec((1, P), lambda n: (0, 0)),
        pl.BlockSpec((1, Cout), lambda n: (0, 0)),
    ]
    args += [params['b1k'], params['b2k'], params['b3k']]
    if has_shortcut:
        in_specs.append(pl.BlockSpec((1, Cout), lambda n: (0, 0)))
        args.append(params['bsck'])

    # ---- VMEM budget: double-buffered blocks + resident weights + scratch ----
    def _bytes(shape, dtype):
        n = 1
        for d in shape:
            n *= int(d)
        return n * jnp.dtype(dtype).itemsize

    vmem = 2 * _bytes((nb, H * W, Cin), jnp.bfloat16)         # input block (dbl-buf)
    vmem += 2 * _bytes((nb, Ho * Wo, Cout), jnp.bfloat16)     # output block (dbl-buf)
    vmem += 2 * sum(int(a.size) * a.dtype.itemsize for a in args[1:])  # weights/biases
    vmem += _bytes((nb, H + 2, W + 10, P), jnp.bfloat16)      # pad scratch
    vmem += _bytes((nb, Ho, Wo, 9 * P), jnp.bfloat16)         # im2col scratch
    vmem += _bytes((nb * H * W, P), jnp.float32)              # conv1 f32 accum
    vmem += _bytes((nb * Ho * Wo, 9 * P), jnp.bfloat16)       # im2col value copy
    vmem += 3 * _bytes((nb * Ho * Wo, Cout), jnp.float32)     # h3 / shortcut / out temps
    try:
        cap = int(pltpu.get_tpu_info().vmem_capacity_bytes)
    except Exception:
        cap = 128 << 20
    vmem_limit = int(min(max(int(1.5 * vmem), 16 << 20), int(0.8 * cap)))

    out_flat = pl.pallas_call(
        kernel,
        out_shape=jax.ShapeDtypeStruct((N, Ho * Wo, Cout), jnp.bfloat16),
        grid_spec=pltpu.PrefetchScalarGridSpec(
            num_scalar_prefetch=0,
            grid=(N // nb,),
            in_specs=in_specs,
            out_specs=pl.BlockSpec((nb, Ho * Wo, Cout), lambda n: (n, 0, 0)),
            scratch_shapes=[
                pltpu.VMEM((nb, H + 2, W + 10, P), jnp.bfloat16),   # padded conv1 out
                pltpu.VMEM((nb, Ho, Wo, 9 * P), jnp.bfloat16),      # im2col
            ],
        ),
        compiler_params=pltpu.CompilerParams(
            dimension_semantics=("parallel",),
            vmem_limit_bytes=vmem_limit),
    )(*args)

    # glue: flat bf16 -> NCHW f32 (module semantics)
    out = out_flat.reshape(N, Ho, Wo, Cout)
    return jnp.transpose(out, (0, 3, 1, 2)).astype(jnp.float32)


# ---------------------------------------------------------------------------
# Deterministic parameter construction (PyTorch shapes: conv weight OIHW)
# ---------------------------------------------------------------------------
def make_params(key, in_planes, planes, stride):
    expansion = 4
    cout = expansion * planes
    ks = jax.random.split(key, 12)
    eps = 1e-5

    def bn_fold(kg, kb, c):
        gamma = jax.random.normal(kg, (c,), jnp.float32) * 0.1 + 1.0
        beta = jax.random.normal(kb, (c,), jnp.float32) * 0.1
        # fresh nn.BatchNorm2d running stats in eval mode: mean=0, var=1
        scale = gamma / jnp.sqrt(1.0 + eps)
        bias = beta                       # beta - mean*scale, mean=0
        return scale, bias

    w1_oihw = jax.random.normal(ks[0], (planes, in_planes, 1, 1), jnp.float32) * 0.2
    w2_oihw = jax.random.normal(ks[1], (planes, planes, 3, 3), jnp.float32) * 0.2
    w3_oihw = jax.random.normal(ks[2], (cout, planes, 1, 1), jnp.float32) * 0.2
    s1, b1 = bn_fold(ks[3], ks[4], planes)
    s2, b2 = bn_fold(ks[5], ks[6], planes)
    s3, b3 = bn_fold(ks[7], ks[8], cout)

    has_shortcut = (stride != 1) or (in_planes != cout)

    # kernel-layout weights with the BN scale folded in, cast to bf16 for the MXU
    w1f = (jnp.transpose(w1_oihw[:, :, 0, 0], (1, 0)) * s1[None, :]).astype(jnp.bfloat16)
    w2_hwio = jnp.transpose(w2_oihw, (2, 3, 1, 0))            # (3, 3, Pin, Pout)
    w2f = (w2_hwio * s2[None, None, None, :]).reshape(9 * planes, planes).astype(jnp.bfloat16)
    w3f = (jnp.transpose(w3_oihw[:, :, 0, 0], (1, 0)) * s3[None, :]).astype(jnp.bfloat16)

    params = dict(
        # kernel weights/biases (BN folded)
        w1f=w1f, w2f=w2f, w3f=w3f,
        b1k=b1.reshape(1, -1), b2k=b2.reshape(1, -1), b3k=b3.reshape(1, -1),
        # pieces for the pure-JAX f32 reference
        s1=s1, b1=b1, s2=s2, b2=b2, s3=s3, b3=b3,
        w1_oihw=w1_oihw, w2_oihw=w2_oihw, w3_oihw=w3_oihw,
        has_shortcut=has_shortcut,
    )

    if has_shortcut:
        wsc_oihw = jax.random.normal(ks[9], (cout, in_planes, 1, 1), jnp.float32) * 0.2
        ssc, bsc = bn_fold(ks[10], ks[11], cout)
        wscf = (jnp.transpose(wsc_oihw[:, :, 0, 0], (1, 0)) * ssc[None, :]).astype(jnp.bfloat16)
        params.update(wscf=wscf, bsck=bsc.reshape(1, -1),
                      ssc=ssc, bsc=bsc, wsc_oihw=wsc_oihw)
    return params


def reference_forward(x, p, *, stride):
    dn = ('NCHW', 'OIHW', 'NCHW')

    def conv(x, w, s=1, pad=0):
        return lax.conv_general_dilated(x, w, (s, s), [(pad, pad), (pad, pad)],
                                        dimension_numbers=dn)

    def bn(x, scale, bias):
        return x * scale.reshape(1, -1, 1, 1) + bias.reshape(1, -1, 1, 1)

    out = jax.nn.relu(bn(conv(x, p['w1_oihw']), p['s1'], p['b1']))
    out = jax.nn.relu(bn(conv(out, p['w2_oihw'], stride, 1), p['s2'], p['b2']))
    out = bn(conv(out, p['w3_oihw']), p['s3'], p['b3'])
    sc = x
    if p['has_shortcut']:
        sc = bn(conv(x, p['wsc_oihw'], stride), p['ssc'], p['bsc'])
    return jax.nn.relu(out + sc)


if __name__ == "__main__":
    key = jax.random.PRNGKey(0)

    # case 1: projection shortcut (in_planes != 4*planes), stride=1
    # case 2: identity shortcut (in_planes == 4*planes), stride=1
    cases = [
        dict(N=2, in_planes=8, planes=4, H=8, W=8, stride=1),
        dict(N=2, in_planes=16, planes=4, H=8, W=8, stride=1),
    ]
    for i, c in enumerate(cases):
        kx, kp, key = jax.random.split(key, 3)
        x = jax.random.normal(kx, (c['N'], c['in_planes'], c['H'], c['W']), jnp.float32)
        params = make_params(kp, c['in_planes'], c['planes'], c['stride'])

        out = bottleneck_forward(x, params, stride=c['stride'])
        out = jax.block_until_ready(out)

        ref = reference_forward(x, params, stride=c['stride'])
        assert out.shape == ref.shape, (out.shape, ref.shape)
        err = float(jnp.max(jnp.abs(out - ref)))
        # bf16 MXU operands + bf16 output vs. a pure-f32 reference -> loose tolerance
        assert jnp.allclose(out, ref, atol=5e-2, rtol=5e-2), (i, err)

    print("KERNEL_OK")
</pallas_src>

<mosaic_0001>
module attributes {stable_mosaic.version = 11 : i64} {
  func.func @_bottleneck_kernel(%arg0: i32, %arg1: memref<1x64x8xbf16, #tpu.memory_space<vmem>>, %arg2: memref<8x4xbf16, #tpu.memory_space<vmem>>, %arg3: memref<36x4xbf16, #tpu.memory_space<vmem>>, %arg4: memref<4x16xbf16, #tpu.memory_space<vmem>>, %arg5: memref<8x16xbf16, #tpu.memory_space<vmem>>, %arg6: memref<1x4xf32, #tpu.memory_space<vmem>>, %arg7: memref<1x4xf32, #tpu.memory_space<vmem>>, %arg8: memref<1x16xf32, #tpu.memory_space<vmem>>, %arg9: memref<1x16xf32, #tpu.memory_space<vmem>>, %arg10: memref<1x64x16xbf16, #tpu.memory_space<vmem>>, %arg11: memref<1x10x18x4xbf16, #tpu.memory_space<vmem>>, %arg12: memref<1x8x8x36xbf16, #tpu.memory_space<vmem>>) attributes {dimension_semantics = [#tpu.dimension_semantics<parallel>], iteration_bounds = array<i64: 2>, scalar_prefetch = 0 : i64, scratch_operands = 2 : i64, tpu.core_type = #tpu.core_type<tc>, window_params = [{transform_indices = @transform_0, window_bounds = array<i64: 1, 64, 8>}, {pipeline_mode = #tpu.pipeline_mode<synchronous>, transform_indices = @transform_1, window_bounds = array<i64: 8, 4>}, {pipeline_mode = #tpu.pipeline_mode<synchronous>, transform_indices = @transform_2, window_bounds = array<i64: 36, 4>}, {pipeline_mode = #tpu.pipeline_mode<synchronous>, transform_indices = @transform_3, window_bounds = array<i64: 4, 16>}, {pipeline_mode = #tpu.pipeline_mode<synchronous>, transform_indices = @transform_4, window_bounds = array<i64: 8, 16>}, {pipeline_mode = #tpu.pipeline_mode<synchronous>, transform_indices = @transform_5, window_bounds = array<i64: 1, 4>}, {pipeline_mode = #tpu.pipeline_mode<synchronous>, transform_indices = @transform_6, window_bounds = array<i64: 1, 4>}, {pipeline_mode = #tpu.pipeline_mode<synchronous>, transform_indices = @transform_7, window_bounds = array<i64: 1, 16>}, {pipeline_mode = #tpu.pipeline_mode<synchronous>, transform_indices = @transform_8, window_bounds = array<i64: 1, 16>}, {transform_indices = @transform_9, window_bounds = array<i64: 1, 64, 16>}]} {
    %cst = arith.constant 0.000000e+00 : bf16
    %0 = vector.broadcast %cst : bf16 to vector<1x1x10x4xbf16>
    %c0 = arith.constant 0 : index
    %c0_0 = arith.constant 0 : index
    %c7 = arith.constant 7 : index
    %c0_1 = arith.constant 0 : index
    %1 = vector.load %arg11[%c0, %c0_0, %c7, %c0_1] : memref<1x10x18x4xbf16, #tpu.memory_space<vmem>>, vector<1x1x10x4xbf16>
    tpu.vector_store %arg11[%c0, %c0_0, %c7, %c0_1], %0 {strides = array<i32>} : memref<1x10x18x4xbf16, #tpu.memory_space<vmem>>, vector<1x1x10x4xbf16>,
    %c0_2 = arith.constant 0 : index
    %c9 = arith.constant 9 : index
    %c7_3 = arith.constant 7 : index
    %c0_4 = arith.constant 0 : index
    %2 = vector.load %arg11[%c0_2, %c9, %c7_3, %c0_4] : memref<1x10x18x4xbf16, #tpu.memory_space<vmem>>, vector<1x1x10x4xbf16>
    tpu.vector_store %arg11[%c0_2, %c9, %c7_3, %c0_4], %0 {strides = array<i32>} : memref<1x10x18x4xbf16, #tpu.memory_space<vmem>>, vector<1x1x10x4xbf16>,
    %cst_5 = arith.constant 0.000000e+00 : bf16
    %3 = vector.broadcast %cst_5 : bf16 to vector<1x8x1x4xbf16>
    %c0_6 = arith.constant 0 : index
    %c1 = arith.constant 1 : index
    %c7_7 = arith.constant 7 : index
    %c0_8 = arith.constant 0 : index
    %4 = vector.load %arg11[%c0_6, %c1, %c7_7, %c0_8] : memref<1x10x18x4xbf16, #tpu.memory_space<vmem>>, vector<1x8x1x4xbf16>
    tpu.vector_store %arg11[%c0_6, %c1, %c7_7, %c0_8], %3 {strides = array<i32>} : memref<1x10x18x4xbf16, #tpu.memory_space<vmem>>, vector<1x8x1x4xbf16>,
    %c0_9 = arith.constant 0 : index
    %c1_10 = arith.constant 1 : index
    %c16 = arith.constant 16 : index
    %c0_11 = arith.constant 0 : index
    %5 = vector.load %arg11[%c0_9, %c1_10, %c16, %c0_11] : memref<1x10x18x4xbf16, #tpu.memory_space<vmem>>, vector<1x8x1x4xbf16>
    tpu.vector_store %arg11[%c0_9, %c1_10, %c16, %c0_11], %3 {strides = array<i32>} : memref<1x10x18x4xbf16, #tpu.memory_space<vmem>>, vector<1x8x1x4xbf16>,
    %c0_12 = arith.constant 0 : index
    %c0_13 = arith.constant 0 : index
    %c0_14 = arith.constant 0 : index
    %6 = vector.load %arg1[%c0_12, %c0_13, %c0_14] : memref<1x64x8xbf16, #tpu.memory_space<vmem>>, vector<1x64x8xbf16>
    %7 = vector.shape_cast %6 : vector<1x64x8xbf16> to vector<64x8xbf16>
    %c0_15 = arith.constant 0 : index
    %c0_16 = arith.constant 0 : index
    %8 = vector.load %arg2[%c0_15, %c0_16] : memref<8x4xbf16, #tpu.memory_space<vmem>>, vector<8x4xbf16>
    %cst_17 = arith.constant dense<0.000000e+00> : vector<64x4xf32>
    %9 = tpu.matmul %7, %8, %cst_17 {dimension_numbers = #tpu.dot_dimension_numbers<[1], [0], [0], [1], [0, 0, 1, 1], [], []>} : vector<64x8xbf16>, vector<8x4xbf16>, vector<64x4xf32> -> vector<64x4xf32>
    %c0_18 = arith.constant 0 : index
    %c0_19 = arith.constant 0 : index
    %10 = vector.load %arg6[%c0_18, %c0_19] : memref<1x4xf32, #tpu.memory_space<vmem>>, vector<1x4xf32>
    %11 = vector.broadcast %10 : vector<1x4xf32> to vector<64x4xf32>
    %12 = arith.addf %9, %11 : vector<64x4xf32>
    %cst_20 = arith.constant 0.000000e+00 : f32
    %13 = vector.broadcast %cst_20 : f32 to vector<64x4xf32>
    %14 = arith.maximumf %12, %13 : vector<64x4xf32>
    %15 = arith.truncf %14 : vector<64x4xf32> to vector<64x4xbf16>
    %16 = vector.shape_cast %15 : vector<64x4xbf16> to vector<1x8x8x4xbf16>
    %c0_21 = arith.constant 0 : index
    %c1_22 = arith.constant 1 : index
    %c8 = arith.constant 8 : index
    %c0_23 = arith.constant 0 : index
    %17 = vector.load %arg11[%c0_21, %c1_22, %c8, %c0_23] : memref<1x10x18x4xbf16, #tpu.memory_space<vmem>>, vector<1x8x8x4xbf16>
    tpu.vector_store %arg11[%c0_21, %c1_22, %c8, %c0_23], %16 {strides = array<i32>} : memref<1x10x18x4xbf16, #tpu.memory_space<vmem>>, vector<1x8x8x4xbf16>,
    %c0_24 = arith.constant 0 : index
    %c0_25 = arith.constant 0 : index
    %c7_26 = arith.constant 7 : index
    %c0_27 = arith.constant 0 : index
    %18 = vector.load %arg11[%c0_24, %c0_25, %c7_26, %c0_27] : memref<1x10x18x4xbf16, #tpu.memory_space<vmem>>, vector<1x8x8x4xbf16>
    %c0_28 = arith.constant 0 : index
    %c0_29 = arith.constant 0 : index
    %c0_30 = arith.constant 0 : index
    %c0_31 = arith.constant 0 : index
    %19 = vector.load %arg12[%c0_28, %c0_29, %c0_30, %c0_31] : memref<1x8x8x36xbf16, #tpu.memory_space<vmem>>, vector<1x8x8x4xbf16>
    tpu.vector_store %arg12[%c0_28, %c0_29, %c0_30, %c0_31], %18 {strides = array<i32>} : memref<1x8x8x36xbf16, #tpu.memory_space<vmem>>, vector<1x8x8x4xbf16>,
    %c0_32 = arith.constant 0 : index
    %c0_33 = arith.constant 0 : index
    %c8_34 = arith.constant 8 : index
    %c0_35 = arith.constant 0 : index
    %20 = vector.load %arg11[%c0_32, %c0_33, %c8_34, %c0_35] : memref<1x10x18x4xbf16, #tpu.memory_space<vmem>>, vector<1x8x8x4xbf16>
    %c0_36 = arith.constant 0 : index
    %c0_37 = arith.constant 0 : index
    %c0_38 = arith.constant 0 : index
    %c4 = arith.constant 4 : index
    %21 = vector.load %arg12[%c0_36, %c0_37, %c0_38, %c4] : memref<1x8x8x36xbf16, #tpu.memory_space<vmem>>, vector<1x8x8x4xbf16>
    tpu.vector_store %arg12[%c0_36, %c0_37, %c0_38, %c4], %20 {strides = array<i32>} : memref<1x8x8x36xbf16, #tpu.memory_space<vmem>>, vector<1x8x8x4xbf16>,
    %c0_39 = arith.constant 0 : index
    %c0_40 = arith.constant 0 : index
    %c9_41 = arith.constant 9 : index
    %c0_42 = arith.constant 0 : index
    %22 = vector.load %arg11[%c0_39, %c0_40, %c9_41, %c0_42] : memref<1x10x18x4xbf16, #tpu.memory_space<vmem>>, vector<1x8x8x4xbf16>
    %c0_43 = arith.constant 0 : index
    %c0_44 = arith.constant 0 : index
    %c0_45 = arith.constant 0 : index
    %c8_46 = arith.constant 8 : index
    %23 = vector.load %arg12[%c0_43, %c0_44, %c0_45, %c8_46] : memref<1x8x8x36xbf16, #tpu.memory_space<vmem>>, vector<1x8x8x4xbf16>
    tpu.vector_store %arg12[%c0_43, %c0_44, %c0_45, %c8_46], %22 {strides = array<i32>} : memref<1x8x8x36xbf16, #tpu.memory_space<vmem>>, vector<1x8x8x4xbf16>,
    %c0_47 = arith.constant 0 : index
    %c1_48 = arith.constant 1 : index
    %c7_49 = arith.constant 7 : index
    %c0_50 = arith.constant 0 : index
    %24 = vector.load %arg11[%c0_47, %c1_48, %c7_49, %c0_50] : memref<1x10x18x4xbf16, #tpu.memory_space<vmem>>, vector<1x8x8x4xbf16>
    %c0_51 = arith.constant 0 : index
    %c0_52 = arith.constant 0 : index
    %c0_53 = arith.constant 0 : index
    %c12 = arith.constant 12 : index
    %25 = vector.load %arg12[%c0_51, %c0_52, %c0_53, %c12] : memref<1x8x8x36xbf16, #tpu.memory_space<vmem>>, vector<1x8x8x4xbf16>
    tpu.vector_store %arg12[%c0_51, %c0_52, %c0_53, %c12], %24 {strides = array<i32>} : memref<1x8x8x36xbf16, #tpu.memory_space<vmem>>, vector<1x8x8x4xbf16>,
    %c0_54 = arith.constant 0 : index
    %c1_55 = arith.constant 1 : index
    %c8_56 = arith.constant 8 : index
    %c0_57 = arith.constant 0 : index
    %26 = vector.load %arg11[%c0_54, %c1_55, %c8_56, %c0_57] : memref<1x10x18x4xbf16, #tpu.memory_space<vmem>>, vector<1x8x8x4xbf16>
    %c0_58 = arith.constant 0 : index
    %c0_59 = arith.constant 0 : index
    %c0_60 = arith.constant 0 : index
    %c16_61 = arith.constant 16 : index
    %27 = vector.load %arg12[%c0_58, %c0_59, %c0_60, %c16_61] : memref<1x8x8x36xbf16, #tpu.memory_space<vmem>>, vector<1x8x8x4xbf16>
    tpu.vector_store %arg12[%c0_58, %c0_59, %c0_60, %c16_61], %26 {strides = array<i32>} : memref<1x8x8x36xbf16, #tpu.memory_space<vmem>>, vector<1x8x8x4xbf16>,
    %c0_62 = arith.constant 0 : index
    %c1_63 = arith.constant 1 : index
    %c9_64 = arith.constant 9 : index
    %c0_65 = arith.constant 0 : index
    %28 = vector.load %arg11[%c0_62, %c1_63, %c9_64, %c0_65] : memref<1x10x18x4xbf16, #tpu.memory_space<vmem>>, vector<1x8x8x4xbf16>
    %c0_66 = arith.constant 0 : index
    %c0_67 = arith.constant 0 : index
    %c0_68 = arith.constant 0 : index
    %c20 = arith.constant 20 : index
    %29 = vector.load %arg12[%c0_66, %c0_67, %c0_68, %c20] : memref<1x8x8x36xbf16, #tpu.memory_space<vmem>>, vector<1x8x8x4xbf16>
    tpu.vector_store %arg12[%c0_66, %c0_67, %c0_68, %c20], %28 {strides = array<i32>} : memref<1x8x8x36xbf16, #tpu.memory_space<vmem>>, vector<1x8x8x4xbf16>,
    %c0_69 = arith.constant 0 : index
    %c2 = arith.constant 2 : index
    %c7_70 = arith.constant 7 : index
    %c0_71 = arith.constant 0 : index
    %30 = vector.load %arg11[%c0_69, %c2, %c7_70, %c0_71] : memref<1x10x18x4xbf16, #tpu.memory_space<vmem>>, vector<1x8x8x4xbf16>
    %c0_72 = arith.constant 0 : index
    %c0_73 = arith.constant 0 : index
    %c0_74 = arith.constant 0 : index
    %c24 = arith.constant 24 : index
    %31 = vector.load %arg12[%c0_72, %c0_73, %c0_74, %c24] : memref<1x8x8x36xbf16, #tpu.memory_space<vmem>>, vector<1x8x8x4xbf16>
    tpu.vector_store %arg12[%c0_72, %c0_73, %c0_74, %c24], %30 {strides = array<i32>} : memref<1x8x8x36xbf16, #tpu.memory_space<vmem>>, vector<1x8x8x4xbf16>,
    %c0_75 = arith.constant 0 : index
    %c2_76 = arith.constant 2 : index
    %c8_77 = arith.constant 8 : index
    %c0_78 = arith.constant 0 : index
    %32 = vector.load %arg11[%c0_75, %c2_76, %c8_77, %c0_78] : memref<1x10x18x4xbf16, #tpu.memory_space<vmem>>, vector<1x8x8x4xbf16>
    %c0_79 = arith.constant 0 : index
    %c0_80 = arith.constant 0 : index
    %c0_81 = arith.constant 0 : index
    %c28 = arith.constant 28 : index
    %33 = vector.load %arg12[%c0_79, %c0_80, %c0_81, %c28] : memref<1x8x8x36xbf16, #tpu.memory_space<vmem>>, vector<1x8x8x4xbf16>
    tpu.vector_store %arg12[%c0_79, %c0_80, %c0_81, %c28], %32 {strides = array<i32>} : memref<1x8x8x36xbf16, #tpu.memory_space<vmem>>, vector<1x8x8x4xbf16>,
    %c0_82 = arith.constant 0 : index
    %c2_83 = arith.constant 2 : index
    %c9_84 = arith.constant 9 : index
    %c0_85 = arith.constant 0 : index
    %34 = vector.load %arg11[%c0_82, %c2_83, %c9_84, %c0_85] : memref<1x10x18x4xbf16, #tpu.memory_space<vmem>>, vector<1x8x8x4xbf16>
    %c0_86 = arith.constant 0 : index
    %c0_87 = arith.constant 0 : index
    %c0_88 = arith.constant 0 : index
    %c32 = arith.constant 32 : index
    %35 = vector.load %arg12[%c0_86, %c0_87, %c0_88, %c32] : memref<1x8x8x36xbf16, #tpu.memory_space<vmem>>, vector<1x8x8x4xbf16>
    tpu.vector_store %arg12[%c0_86, %c0_87, %c0_88, %c32], %34 {strides = array<i32>} : memref<1x8x8x36xbf16, #tpu.memory_space<vmem>>, vector<1x8x8x4xbf16>,
    %c0_89 = arith.constant 0 : index
    %c0_90 = arith.constant 0 : index
    %c0_91 = arith.constant 0 : index
    %c0_92 = arith.constant 0 : index
    %36 = vector.load %arg12[%c0_89, %c0_90, %c0_91, %c0_92] : memref<1x8x8x36xbf16, #tpu.memory_space<vmem>>, vector<1x8x8x36xbf16>
    %37 = vector.shape_cast %36 : vector<1x8x8x36xbf16> to vector<64x36xbf16>
    %c0_93 = arith.constant 0 : index
    %c0_94 = arith.constant 0 : index
    %38 = vector.load %arg3[%c0_93, %c0_94] : memref<36x4xbf16, #tpu.memory_space<vmem>>, vector<36x4xbf16>
    %cst_95 = arith.constant dense<0.000000e+00> : vector<64x4xf32>
    %39 = tpu.matmul %37, %38, %cst_95 {dimension_numbers = #tpu.dot_dimension_numbers<[1], [0], [0], [1], [0, 0, 1, 1], [], []>} : vector<64x36xbf16>, vector<36x4xbf16>, vector<64x4xf32> -> vector<64x4xf32>
    %c0_96 = arith.constant 0 : index
    %c0_97 = arith.constant 0 : index
    %40 = vector.load %arg7[%c0_96, %c0_97] : memref<1x4xf32, #tpu.memory_space<vmem>>, vector<1x4xf32>
    %41 = vector.broadcast %40 : vector<1x4xf32> to vector<64x4xf32>
    %42 = arith.addf %39, %41 : vector<64x4xf32>
    %cst_98 = arith.constant 0.000000e+00 : f32
    %43 = vector.broadcast %cst_98 : f32 to vector<64x4xf32>
    %44 = arith.maximumf %42, %43 : vector<64x4xf32>
    %45 = arith.truncf %44 : vector<64x4xf32> to vector<64x4xbf16>
    %c0_99 = arith.constant 0 : index
    %c0_100 = arith.constant 0 : index
    %46 = vector.load %arg4[%c0_99, %c0_100] : memref<4x16xbf16, #tpu.memory_space<vmem>>, vector<4x16xbf16>
    %cst_101 = arith.constant dense<0.000000e+00> : vector<64x16xf32>
    %47 = tpu.matmul %45, %46, %cst_101 {dimension_numbers = #tpu.dot_dimension_numbers<[1], [0], [0], [1], [0, 0, 1, 1], [], []>} : vector<64x4xbf16>, vector<4x16xbf16>, vector<64x16xf32> -> vector<64x16xf32>
    %c0_102 = arith.constant 0 : index
    %c0_103 = arith.constant 0 : index
    %48 = vector.load %arg8[%c0_102, %c0_103] : memref<1x16xf32, #tpu.memory_space<vmem>>, vector<1x16xf32>
    %49 = vector.broadcast %48 : vector<1x16xf32> to vector<64x16xf32>
    %50 = arith.addf %47, %49 : vector<64x16xf32>
    %c0_104 = arith.constant 0 : index
    %c0_105 = arith.constant 0 : index
    %51 = vector.load %arg5[%c0_104, %c0_105] : memref<8x16xbf16, #tpu.memory_space<vmem>>, vector<8x16xbf16>
    %cst_106 = arith.constant dense<0.000000e+00> : vector<64x16xf32>
    %52 = tpu.matmul %7, %51, %cst_106 {dimension_numbers = #tpu.dot_dimension_numbers<[1], [0], [0], [1], [0, 0, 1, 1], [], []>} : vector<64x8xbf16>, vector<8x16xbf16>, vector<64x16xf32> -> vector<64x16xf32>
    %c0_107 = arith.constant 0 : index
    %c0_108 = arith.constant 0 : index
    %53 = vector.load %arg9[%c0_107, %c0_108] : memref<1x16xf32, #tpu.memory_space<vmem>>, vector<1x16xf32>
    %54 = vector.broadcast %53 : vector<1x16xf32> to vector<64x16xf32>
    %55 = arith.addf %52, %54 : vector<64x16xf32>
    %56 = arith.addf %50, %55 : vector<64x16xf32>
    %cst_109 = arith.constant 0.000000e+00 : f32
    %57 = vector.broadcast %cst_109 : f32 to vector<64x16xf32>
    %58 = arith.maximumf %56, %57 : vector<64x16xf32>
    %59 = vector.shape_cast %58 : vector<64x16xf32> to vector<1x64x16xf32>
    %60 = arith.truncf %59 : vector<1x64x16xf32> to vector<1x64x16xbf16>
    %c0_110 = arith.constant 0 : index
    %c0_111 = arith.constant 0 : index
    %c0_112 = arith.constant 0 : index
    %61 = vector.load %arg10[%c0_110, %c0_111, %c0_112] : memref<1x64x16xbf16, #tpu.memory_space<vmem>>, vector<1x64x16xbf16>
    tpu.vector_store %arg10[%c0_110, %c0_111, %c0_112], %60 {strides = array<i32>} : memref<1x64x16xbf16, #tpu.memory_space<vmem>>, vector<1x64x16xbf16>,
    return
  }
  func.func @transform_0(%arg0: i32) -> (i32, i32, i32) {
    %c0_i32 = arith.constant 0 : i32
    %c0_i32_0 = arith.constant 0 : i32
    %c0_i32_1 = arith.constant 0 : i32
    return %arg0, %c0_i32, %c0_i32_0 : i32, i32, i32
  }
  func.func @transform_1(%arg0: i32) -> (i32, i32) {
    %c0_i32 = arith.constant 0 : i32
    %c0_i32_0 = arith.constant 0 : i32
    %c0_i32_1 = arith.constant 0 : i32
    return %c0_i32, %c0_i32_0 : i32, i32
  }
  func.func @transform_2(%arg0: i32) -> (i32, i32) {
    %c0_i32 = arith.constant 0 : i32
    %c0_i32_0 = arith.constant 0 : i32
    %c0_i32_1 = arith.constant 0 : i32
    return %c0_i32, %c0_i32_0 : i32, i32
  }
  func.func @transform_3(%arg0: i32) -> (i32, i32) {
    %c0_i32 = arith.constant 0 : i32
    %c0_i32_0 = arith.constant 0 : i32
    %c0_i32_1 = arith.constant 0 : i32
    return %c0_i32, %c0_i32_0 : i32, i32
  }
  func.func @transform_4(%arg0: i32) -> (i32, i32) {
    %c0_i32 = arith.constant 0 : i32
    %c0_i32_0 = arith.constant 0 : i32
    %c0_i32_1 = arith.constant 0 : i32
    return %c0_i32, %c0_i32_0 : i32, i32
  }
  func.func @transform_5(%arg0: i32) -> (i32, i32) {
    %c0_i32 = arith.constant 0 : i32
    %c0_i32_0 = arith.constant 0 : i32
    %c0_i32_1 = arith.constant 0 : i32
    return %c0_i32, %c0_i32_0 : i32, i32
  }
  func.func @transform_6(%arg0: i32) -> (i32, i32) {
    %c0_i32 = arith.constant 0 : i32
    %c0_i32_0 = arith.constant 0 : i32
    %c0_i32_1 = arith.constant 0 : i32
    return %c0_i32, %c0_i32_0 : i32, i32
  }
  func.func @transform_7(%arg0: i32) -> (i32, i32) {
    %c0_i32 = arith.constant 0 : i32
    %c0_i32_0 = arith.constant 0 : i32
    %c0_i32_1 = arith.constant 0 : i32
    return %c0_i32, %c0_i32_0 : i32, i32
  }
  func.func @transform_8(%arg0: i32) -> (i32, i32) {
    %c0_i32 = arith.constant 0 : i32
    %c0_i32_0 = arith.constant 0 : i32
    %c0_i32_1 = arith.constant 0 : i32
    return %c0_i32, %c0_i32_0 : i32, i32
  }
  func.func @transform_9(%arg0: i32) -> (i32, i32, i32) {
    %c0_i32 = arith.constant 0 : i32
    %c0_i32_0 = arith.constant 0 : i32
    %c0_i32_1 = arith.constant 0 : i32
    return %arg0, %c0_i32, %c0_i32_0 : i32, i32, i32
  }
}

</mosaic_0001>

<bundles_post_ra>
// kernel: tpu_custom_call.1
= control target key start
LH: loop header
LB: loop body
LE: loop exit
PB: predicated region body
PF: predicated region fallthrough
CT: control target
= control target key end

     0   :  { %s2368_s30 = smov 0   ;;  %s2978_s0 = inlined_call_operand.vmem [shape: bf16[2,64,8], index: 0, kind: input, shape index: {}]   ;;  %s2979_s1 = inlined_call_operand.vmem [shape: bf16[8,4], index: 1, kind: input, shape index: {}]   ;;  %s2980_s2 = inlined_call_operand.vmem [shape: bf16[36,4], index: 2, kind: input, shape index: {}]   ;;  %s2981_s3 = inlined_call_operand.vmem [shape: bf16[4,16], index: 3, kind: input, shape index: {}]   ;;  %s2982_s4 = inlined_call_operand.vmem [shape: bf16[8,16], index: 4, kind: input, shape index: {}]   ;;  %s2983_s5 = inlined_call_operand.vmem [shape: f32[1,4], index: 5, kind: input, shape index: {}]   ;;  %s2984_s6 = inlined_call_operand.vmem [shape: f32[1,4], index: 6, kind: input, shape index: {}]   ;;  %s2985_s7 = inlined_call_operand.vmem [shape: f32[1,16], index: 7, kind: input, shape index: {}]   ;;  %s2986_s8 = inlined_call_operand.vmem [shape: f32[1,16], index: 8, kind: input, shape index: {}]   ;;  %s2987_s9 = inlined_call_operand.vmem [shape: bf16[2,64,16], index: 9, kind: output, shape index: {}]  }
   0x1 LB: > { %s2075_s10 = sadd.s32 4294967295, %s2307_s30   ;;  %p2079_p0 = scmp.ge.s32.totalorder %s2307_s30, 1  ;;  %s2307_s30 = sphi %s2368_s30, %s19_s30  }
   0x2   : > { %p287_p1 = scmp.lt.s32.totalorder %s2307_s30, 3 }
   0x4   : > { %p288_p2 = pnand %p2079_p0, %p287_p1 }
   0x5   : > { %v413_v0 = vld [vmem:[%s2979_s1] sm:$0xf] (!%p288_p2)  ;;  %vm454_vm0 = vcmask (!%p288_p2), 1043456   ;;  %p323_p3 = scmp.lt.s32.totalorder (!%p288_p2), %s2075_s10, 1  ;;  %vm441_vm1 = vcmask (!%p288_p2), 64512   ;;  %vm340_vm2 = vcmask (!%p288_p2), 27648  }
   0x6   : > { %291 = sbr.rel (%p288_p2) target bundleno = 946 (0x3b2), region = 56  ;;  %2265 = vmatprep.subr.msk.bf16.mxu1 (!%p288_p2), %vm454_vm0, %v413_v0  ;;  %v456_v1 = vsel (!%p288_p2), %vm454_vm0, %v413_v0, 0  ;;  %v2309_v6 = vmov (!%p288_p2), 0   ;;  %vm342_vm3 = vcmask (!%p288_p2), 24576   ;;  %vm343_vm4 = vsmask.f32 (!%p288_p2), 256 }
   0x7   : > { %2198 = vmatpush3.bf16.msra.mxu1 (!%p288_p2), %v456_v1  ;;  %352 = vst.msk [vmem:[#allocation2 + $0x70] sm:$0xf] (!%p288_p2), %vm340_vm2, %v2309_v6  ;;  %341 = vst.msk [vmem:[#allocation2 + $0x4] sm:$0xf] (!%p288_p2), %vm340_vm2, %v2309_v6  ;;  %vm334_vm5 = vcmask (!%p288_p2), 27651   ;;  %s2310_s17 = smov (!%p288_p2), 28  }
   0x8   : > { %vm335_vm6 = vsmask.f32 (!%p288_p2), 7950  ;;  %vm2402_vm7 = vmand (!%p288_p2), %vm342_vm3, %vm343_vm4  ;;  %v345_v8 = vld [vmem:[#allocation2 + $0x8] sm:$0x1] (!%p288_p2)  ;;  %v349_v9 = vld [vmem:[#allocation2 + $0x6c] sm:$0x8] (!%p288_p2) }
   0x9   : > { %v346_v10 = vsel (!%p288_p2), %vm2402_vm7, 0, %v345_v8  ;;  %vm2408_vm8 = vmand (!%p288_p2), %vm334_vm5, %vm335_vm6  ;;  %s2311_s18 = smov (!%p288_p2), 4   ;;  %vm587_vm9 = vsmask.f32 (!%p288_p2), 4368  ;;  %vm774_vm10 = vsmask.f32 (!%p288_p2), 3328 }
   0xa   : > { %347 = vst [vmem:[#allocation2 + $0x8] sm:$0x1] (!%p288_p2), %v346_v10  ;;  %v350_v12 = vsel (!%p288_p2), %vm2408_vm8, 0, %v349_v9  ;;  %vm775_vm11 = vsmask.f32 (!%p288_p2), 7440  ;;  %vm2417_vm12 = vmor (!%p288_p2), %vm343_vm4, %vm587_vm9  ;;  %s2312_s19 = smov (!%p288_p2), 8  }
   0xb   : > { %351 = vst [vmem:[#allocation2 + $0x6c] sm:$0x8] (!%p288_p2), %v350_v12  ;;  %v363_v33 = vld [vmem:[#allocation2 + $0x24] sm:$0x8] (!%p288_p2)  ;;  %vm2421_vm13 = vmor (!%p288_p2), %vm774_vm10, %vm775_vm11  ;;  %v357_v38 = vld [vmem:[#allocation2 + $0xc] sm:$0x8] (!%p288_p2) }
   0xc   : > { %v364_v35 = vsel (!%p288_p2), %vm2408_vm8, 0, %v363_v33  ;;  %v358_v40 = vsel (!%p288_p2), %vm2408_vm8, 0, %v357_v38  ;;  %v387_v41 = vld [vmem:[#allocation2 + $0x2c] sm:$0x1] (!%p288_p2)  ;;  %s2313_s20 = smov (!%p288_p2), 24   ;;  %vm749_vm14 = vcmask (!%p288_p2), 60448  }
   0xd   : > { %s2997_s10 = smov (!%p323_p3, %s2075_s10), 1  ;;  %365 = vst [vmem:[#allocation2 + $0x24] sm:$0x8] %v364_v35  ;;  %359 = vst [vmem:[#allocation2 + $0xc] sm:$0x8] %v358_v40  ;;  %v388_v42 = vsel %vm2402_vm7, 0, %v387_v41 }
   0xe   : > { %s2157_s13 = sshll.u32 %s2997_s10, 5  ;;  %v758_v13 = vld [vmem:[#allocation2 + $0x4] sm:$0xf]  ;;  %v1301_v16 = vld [vmem:[#allocation2 + $0x70] sm:$0xf]  ;;  %vm913_vm15 = vcmask 93248  }
   0xf   : > { %s2389_s16 = scalar_lea.vmem %s2978_s0, %s2157_s13  ;;  %v778_v14 = vshrl.u32 %v758_v13, 16  ;;  %v781_v15 = vshll.u32 %v758_v13, 16  ;;  %v1399_v19 = vshrl.u32 %v1301_v16, 16  ;;  %v1446_v21 = vld [vmem:[#allocation2 + $0x70] sm:$0xf]  ;;  %v1402_v27 = vshll.u32 %v1301_v16, 16  ;;  %s2957_s27 = scalar_lea.vmem %s2987_s9, %s2157_s13 }
  0x10   : > { %v2286_v2 = vld [vmem:[%s2389_s16] sm:$0xff]   ;;  %v2287_v3 = vld [vmem:[%s2389_s16 + $0x8] sm:$0xff]   ;;  %v2288_v4 = vld [vmem:[%s2389_s16 + $0x10] sm:$0xff]   ;;  %1469 = vrot.lane.b32.xlu1 %v1446_v21, %s2310_s17  ;;  %389 = vst [vmem:[#allocation2 + $0x2c] sm:$0x1] %v388_v42  ;;  %s2314_s23 = smov 16  }
  0x11   : > { %2199 = vmatprep.mubr.msk.bf16.mxu1 %vm441_vm1, %v2286_v2  ;;  %v2289_v5 = vld [vmem:[%s2389_s16 + $0x18] sm:$0xff]   ;;  %v780_v17 = vrot.slane %v778_v14, 4  ;;  %v783_v18 = vrot.slane %v781_v15, 5  ;;  %v759_v20 = vld [vmem:[#allocation2 + $0x8] sm:$0x1]  ;;  %v1401_v26 = vrot.slane %v1399_v19, 7 }
  0x12   : > { %2200 = vmatmul.mubr.msk.bf16.vlgmr.msra.gmra.mrb[0].mxu1 %vm441_vm1, %v2287_v3  ;;  %v709_v22 = vld [vmem:[#allocation2 + $0x4] sm:$0xf]  ;;  %v787_v24 = vshll.u32 %v759_v20, 16  ;;  %v1300_v25 = vld [vmem:[#allocation2 + $0x6c] sm:$0x8]  ;;  %s2315_s24 = smov 12  }
  0x13   : > { %2203 = vmatprep.mubr.msk.bf16.mxu1 %vm441_vm1, %v2288_v4  ;;  %v784_v23 = vor.u32 %v783_v18, %v780_v17  ;;  %725 = vrot.lane.b32.xlu0 %v709_v22, %s2311_s18  ;;  %v1394_v31 = vshrl.u32 %v1300_v25, 16  ;;  %v1404_v32 = vor.u32 %v1402_v27, %v1401_v26  ;;  %v366_v43 = vld [vmem:[#allocation2 + $0x30] sm:$0x8]  ;;  %v381_v45 = vld [vmem:[#allocation2 + $0x14] sm:$0x1]  ;;  %s2316_s25 = smov 20  }
  0x14   : > { %v789_v30 = vrot.slane %v787_v24, 5  ;;  %v367_v44 = vsel %vm2408_vm8, 0, %v366_v43  ;;  %v382_v46 = vsel %vm2402_vm7, 0, %v381_v45  ;;  %v360_v47 = vld [vmem:[#allocation2 + $0x18] sm:$0x8]  ;;  %s2317_s26 = smov 32  }
  0x15   : > { %v785_v29 = vrot.slane %v784_v23, 4  ;;  %v2124_v37 = vrot.slane %v1394_v31, 11  ;;  %368 = vst [vmem:[#allocation2 + $0x30] sm:$0x8] %v367_v44  ;;  %383 = vst [vmem:[#allocation2 + $0x14] sm:$0x1] %v382_v46 }
  0x16   : > { %v361_v48 = vsel %vm2408_vm8, 0, %v360_v47  ;;  %v390_v49 = vld [vmem:[#allocation2 + $0x38] sm:$0x1]  ;;  %v384_v51 = vld [vmem:[#allocation2 + $0x20] sm:$0x1]  ;;  %vm1066_vm3 = vcmask 126048  }
  0x17   : > { %v790_v36 = vsel %vm2421_vm13, %v785_v29, %v789_v30  ;;  %v1405_v39 = vsel %vm2417_vm12, %v2124_v37, %v1404_v32  ;;  %362 = vst [vmem:[#allocation2 + $0x18] sm:$0x8] %v361_v48  ;;  %v391_v50 = vsel %vm2402_vm7, 0, %v390_v49  ;;  %v385_v52 = vsel %vm2402_vm7, 0, %v384_v51  ;;  %v375_v53 = vld [vmem:[#allocation2 + $0x54] sm:$0x8] }
  0x18   : > { %889 = vrot.lane.b32.xlu0 %v790_v36, %s2312_s19  ;;  %1420 = vrot.lane.b32.xlu1 %v1405_v39, %s2313_s20  ;;  %392 = vst [vmem:[#allocation2 + $0x38] sm:$0x1] %v391_v50  ;;  %386 = vst [vmem:[#allocation2 + $0x20] sm:$0x1] %v385_v52  ;;  %v376_v54 = vsel %vm2408_vm8, 0, %v375_v53  ;;  %vm1115_vm4 = vcmask 158848  }
  0x19   : > { %377 = vst [vmem:[#allocation2 + $0x54] sm:$0x8] %v376_v54  ;;  %v369_v55 = vld [vmem:[#allocation2 + $0x3c] sm:$0x8]  ;;  %v378_v57 = vld [vmem:[#allocation2 + $0x60] sm:$0x8] }
  0x1a   : > { %2204 = vmatmul.mubr.msk.bf16.gmra.mrb[4].mxu1 %vm441_vm1, %v2289_v5  ;;  %v370_v56 = vsel %vm2408_vm8, 0, %v369_v55  ;;  %v372_v58 = vld [vmem:[#allocation2 + $0x48] sm:$0x8]  ;;  %v379_v59 = vsel %vm2408_vm8, 0, %v378_v57  ;;  %v399_v61 = vld [vmem:[#allocation2 + $0x5c] sm:$0x1] }
  0x1b   : > { %371 = vst [vmem:[#allocation2 + $0x3c] sm:$0x8] %v370_v56  ;;  %v373_v60 = vsel %vm2408_vm8, 0, %v372_v58  ;;  %380 = vst [vmem:[#allocation2 + $0x60] sm:$0x8] %v379_v59  ;;  %v400_v63 = vsel %vm2402_vm7, 0, %v399_v61 }
  0x1c   : > { %374 = vst [vmem:[#allocation2 + $0x48] sm:$0x8] %v373_v60  ;;  %v393_v62 = vld [vmem:[#allocation2 + $0x44] sm:$0x1]  ;;  %v402_v1 = vld [vmem:[#allocation2 + $0x68] sm:$0x1] }
  0x1d   : > { %v394_v0 = vsel %vm2402_vm7, 0, %v393_v62  ;;  %v396_v2 = vld [vmem:[#allocation2 + $0x50] sm:$0x1]  ;;  %401 = vst [vmem:[#allocation2 + $0x5c] sm:$0x1] %v400_v63  ;;  %v403_v3 = vsel %vm2402_vm7, 0, %v402_v1 }
  0x1e   : > { %395 = vst [vmem:[#allocation2 + $0x44] sm:$0x1] %v394_v0  ;;  %v397_v4 = vsel %vm2402_vm7, 0, %v396_v2  ;;  %404 = vst [vmem:[#allocation2 + $0x68] sm:$0x1] %v403_v3  ;;  %vm1276_vm5 = vcmask 191648  }
  0x1f   : > { %398 = vst [vmem:[#allocation2 + $0x50] sm:$0x1] %v397_v4  ;;  %v337_v5 = vld [vmem:[#allocation2] sm:$0x8]  ;;  %v572_v6 = vld [vmem:[#allocation2 + $0x4] sm:$0xf] }
  0x20   : > { %v338_v8 = vsel %vm2408_vm8, 0, %v337_v5  ;;  %v595_v9 = vshrl.u32 %v572_v6, 16  ;;  %v598_v12 = vshll.u32 %v572_v6, 16  ;;  %v2084_v13 = vld [vmem:[%s2983_s5] ss:$0 sm:$0xff]  ;;  %vm1430_vm6 = vcmask 224448  }
  0x21   : > { %339 = vst [vmem:[#allocation2] sm:$0x8] %v338_v8  ;;  %v353_v23 = vld [vmem:[#allocation2 + $0x74] sm:$0x1]  ;;  %v1288_v59 = vld [vmem:[#allocation2 + $0x24] sm:$0x8] }
  0x22   : > { %v597_v10 = vrot.slane %v595_v9, 7  ;;  %v354_v27 = vsel %vm2402_vm7, 0, %v353_v23  ;;  %v926_v61 = vld [vmem:[#allocation2 + $0x24] sm:$0x8]  ;;  %v922_v62 = vld [vmem:[#allocation2 + $0xc] sm:$0x8] }
  0x23   : > { %355 = vst [vmem:[#allocation2 + $0x74] sm:$0x1] %v354_v27  ;;  %v765_v63 = vld [vmem:[#allocation2 + $0x2c] sm:$0x1]  ;;  %v928_v0 = vld [vmem:[#allocation2 + $0x30] sm:$0x8] }
  0x24   : > { %v600_v20 = vor.u32 %v598_v12, %v597_v10  ;;  %v1129_v1 = vld [vmem:[#allocation2 + $0x2c] sm:$0x1]  ;;  %v1290_v3 = vld [vmem:[#allocation2 + $0x30] sm:$0x8]  ;;  %v1316_v9 = vshrl.u32 %v1288_v59, 16  ;;  %v965_v10 = vshrl.u32 %v926_v61, 16 }
  0x25   : > { %v1491_v4 = vld [vmem:[#allocation2 + $0x2c] sm:$0x1]  ;;  %v939_v12 = vshrl.u32 %v922_v62, 16  ;;  %vm1479_vm7 = vcmask 257248   ;;  %vm1640_vm8 = vcmask 290048   ;;  %vm1704_vm9 = vcmask 293888  }
  0x26   : > { %vm1806_vm10 = vcmask 31744  }
  0x27   : > { %v2491_v27 = vrot.slane %v939_v12, 11 }
  0x28   : > { %v571_v16 = vld [vmem:[#allocation2] sm:$0x8] }
  0x29   : > { %v590_v19 = vshrl.u32 %v571_v16, 16  ;;  %v1178_v16 = vshll.u32 %v1129_v1, 16 }
  0x2b   : > { %v2101_v26 = vrot.slane %v590_v19, 11 }
  0x2d   : > { %v601_v33 = vsel %vm2417_vm12, %v2101_v26, %v600_v20  ;;  %v2111_v26 = vrot.slane %v965_v10, 11 }
  0x2e   : > { %701 = vst.msk [vmem:[#allocation3] sm:$0xf] %vm340_vm2, %v601_v33 }
  0x85   : > { %v726_v14 = vpop.permute.xlu0 %725 }
  0x86   : > { %750 = vst.msk [vmem:[#allocation3] sm:$0xf] %vm749_vm14, %v726_v14  ;;  %v1125_v14 = vld [vmem:[#allocation2 + $0x14] sm:$0x1] }
  0x8a   : > { %v890_v35 = vpop.permute.xlu0 %889 }
  0x8b   : > { %914 = vst.msk [vmem:[#allocation3] sm:$0xf] %vm913_vm15, %v890_v35  ;;  %v761_v35 = vld [vmem:[#allocation2 + $0x14] sm:$0x1] }
  0xe5   : > { %v2201_v15 = vpop.f32.mrb[0].mxu1 }
  0xe6   : > { %v501_v17 = vadd.f32 %v2201_v15, %v2084_v13  ;;  %v492_v18 = vpop.f32.mrb[1].mxu1  ;;  %v978_v15 = vshrl.u32 %v928_v0, 16 }
  0xe7   : > { %v493_v21 = vadd.f32 %v2084_v13, %v492_v18  ;;  %v2202_v22 = vpop.f32.mrb[2].mxu1 }
  0xe8   : > { %v525_v11 = vmax.f32 %v501_v17, 0.0  ;;  %v504_v24 = vadd.f32 %v2202_v22, %v2084_v13  ;;  %v495_v25 = vpop.f32.mrb[3].mxu1  ;;  %v1329_v17 = vshrl.u32 %v1290_v3, 16 }
  0xe9   : > { %v523_v29 = vmax.f32 %v493_v21, 0.0  ;;  %v496_v30 = vadd.f32 %v2084_v13, %v495_v25  ;;  %v1528_v21 = vshll.u32 %v1491_v4, 16  ;;  %v2118_v25 = vrot.slane %v1316_v9, 11 }
  0xea   : > { %v2161_v31 = vpack.c.bf16 %v525_v11, %v525_v11  ;;  %v526_v32 = vmax.f32 %v504_v24, 0.0  ;;  %v1150_v24 = vshll.u32 %v1125_v14, 16  ;;  %v2499_v33 = vrot.slane %v1329_v17, 11 }
  0xeb   : > { %v2159_v36 = vpack.c.bf16 %v523_v29, %v523_v29  ;;  %v524_v37 = vmax.f32 %v496_v30, 0.0 }
  0xec   : > { %565 = vst.msk [vmem:[#allocation2 + $0x28] sm:$0xf] %vm340_vm2, %v2161_v31  ;;  %v2162_v38 = vpack.c.bf16 %v526_v32, %v526_v32  ;;  %v2495_v31 = vrot.slane %v978_v15, 11  ;;  %v2497_v32 = vrot.slane %v1178_v16, 5 }
  0xed   : > { %563 = vst.msk [vmem:[#allocation2 + $0x10] sm:$0xf] %vm340_vm2, %v2159_v36  ;;  %v2160_v7 = vpack.c.bf16 %v524_v37, %v524_v37  ;;  %v2205_v39 = vpop.f32.mrb[4].mxu1 }
  0xee   : > { %566 = vst.msk [vmem:[#allocation2 + $0x34] sm:$0xf] %vm340_vm2, %v2162_v38  ;;  %v517_v40 = vadd.f32 %v2205_v39, %v2084_v13  ;;  %v508_v41 = vpop.f32.mrb[5].mxu1 }
  0xef   : > { %564 = vst.msk [vmem:[#allocation2 + $0x1c] sm:$0xf] %vm340_vm2, %v2160_v7  ;;  %v509_v42 = vadd.f32 %v2084_v13, %v508_v41  ;;  %v2206_v43 = vpop.f32.mrb[6].mxu1  ;;  %v2501_v7 = vrot.slane %v1528_v21, 5 }
  0xf0   : > { %v529_v44 = vmax.f32 %v517_v40, 0.0  ;;  %v520_v45 = vadd.f32 %v2206_v43, %v2084_v13  ;;  %v511_v46 = vpop.f32.mrb[7].mxu1  ;;  %v2503_v43 = vrot.slane %v1150_v24, 5  ;;  %v577_v24 = vld [vmem:[#allocation2 + $0x24] sm:$0x8] }
  0xf1   : > { %v527_v47 = vmax.f32 %v509_v42, 0.0  ;;  %v512_v48 = vadd.f32 %v2084_v13, %v511_v46  ;;  %v829_v13 = vshll.u32 %v765_v63, 16 }
  0xf2   : > { %v2165_v49 = vpack.c.bf16 %v529_v44, %v529_v44  ;;  %v530_v50 = vmax.f32 %v520_v45, 0.0  ;;  %v1286_v44 = vld [vmem:[#allocation2 + $0x18] sm:$0x8] }
  0xf3   : > { %v1077_v51 = vld [vmem:[#allocation2 + $0x28] sm:$0xf]  ;;  %v2163_v53 = vpack.c.bf16 %v527_v47, %v527_v47  ;;  %v528_v55 = vmax.f32 %v512_v48, 0.0  ;;  %v2493_v29 = vrot.slane %v829_v13, 5  ;;  %v801_v47 = vshll.u32 %v761_v35, 16 }
  0xf4   : > { %v712_v52 = vld [vmem:[#allocation2 + $0x28] sm:$0xf]  ;;  %1095 = vrot.lane.b32.xlu0 %v1077_v51, %s2314_s23  ;;  %569 = vst.msk [vmem:[#allocation2 + $0x58] sm:$0xf] %vm340_vm2, %v2165_v49  ;;  %v2166_v54 = vpack.c.bf16 %v530_v50, %v530_v50  ;;  %v710_v58 = vld [vmem:[#allocation2 + $0x10] sm:$0xf] }
  0xf5   : > { %731 = vrot.lane.b32.xlu1 %v712_v52, %s2311_s18  ;;  %567 = vst.msk [vmem:[#allocation2 + $0x40] sm:$0xf] %vm340_vm2, %v2163_v53  ;;  %v2164_v56 = vpack.c.bf16 %v528_v55, %v528_v55  ;;  %v1440_v57 = vld [vmem:[#allocation2 + $0x28] sm:$0xf]  ;;  %v1075_v2 = vld [vmem:[#allocation2 + $0x10] sm:$0xf] }
  0xf6   : > { %570 = vst.msk [vmem:[#allocation2 + $0x64] sm:$0xf] %vm340_vm2, %v2166_v54  ;;  %v1289_v60 = vld [vmem:[#allocation2 + $0x28] sm:$0xf]  ;;  %v1078_v5 = vld [vmem:[#allocation2 + $0x34] sm:$0xf] }
  0xf7   : > { %568 = vst.msk [vmem:[#allocation2 + $0x4c] sm:$0xf] %vm340_vm2, %v2164_v56  ;;  %v1321_v6 = vshrl.u32 %v1289_v60, 16  ;;  %v927_v8 = vld [vmem:[#allocation2 + $0x28] sm:$0xf]  ;;  %v1324_v30 = vshll.u32 %v1289_v60, 16 }
  0xf8   : > { %727 = vrot.lane.b32.xlu0 %v710_v58, %s2311_s18  ;;  %v711_v18 = vld [vmem:[#allocation2 + $0x1c] sm:$0xf]  ;;  %v1441_v19 = vld [vmem:[#allocation2 + $0x34] sm:$0xf]  ;;  %v970_v20 = vshrl.u32 %v927_v8, 16  ;;  %v973_v45 = vshll.u32 %v927_v8, 16 }
  0xf9   : > { %1457 = vrot.lane.b32.xlu1 %v1440_v57, %s2310_s17  ;;  %v1323_v22 = vrot.slane %v1321_v6, 7  ;;  %v923_v23 = vld [vmem:[#allocation2 + $0x10] sm:$0xf]  ;;  %v764_v11 = vld [vmem:[#allocation2 + $0x28] sm:$0xf]  ;;  %v1303_v63 = vshrl.u32 %v1286_v44, 16 }
  0xfa   : > { %v972_v36 = vrot.slane %v970_v20, 7  ;;  %v944_v37 = vshrl.u32 %v923_v23, 16  ;;  %v820_v38 = vshrl.u32 %v764_v11, 16  ;;  %v1076_v39 = vld [vmem:[#allocation2 + $0x1c] sm:$0xf]  ;;  %v823_v42 = vshll.u32 %v764_v11, 16 }
  0xfb   : > { %v713_v40 = vld [vmem:[#allocation2 + $0x34] sm:$0xf]  ;;  %v1326_v41 = vor.u32 %v1324_v30, %v1323_v22  ;;  %v1128_v46 = vld [vmem:[#allocation2 + $0x28] sm:$0xf]  ;;  %v924_v48 = vld [vmem:[#allocation2 + $0x18] sm:$0x8] }
  0xfc   : > { %1091 = vrot.lane.b32.xlu0 %v1075_v2, %s2314_s23  ;;  %v1493_v49 = vld [vmem:[#allocation2 + $0x38] sm:$0x1]  ;;  %v1439_v52 = vld [vmem:[#allocation2 + $0x1c] sm:$0xf]  ;;  %v975_v53 = vor.u32 %v973_v45, %v972_v36  ;;  %v946_v54 = vrot.slane %v944_v37, 7  ;;  %v822_v55 = vrot.slane %v820_v38, 4 }
  0xfd   : > { %1097 = vrot.lane.b32.xlu1 %v1078_v5, %s2314_s23  ;;  %v1131_v50 = vld [vmem:[#allocation2 + $0x38] sm:$0x1]  ;;  %v1127_v56 = vld [vmem:[#allocation2 + $0x20] sm:$0x1]  ;;  %v1327_v57 = vsel %vm2417_vm12, %v2118_v25, %v1326_v41  ;;  %v825_v58 = vrot.slane %v823_v42, 5  ;;  %v1169_v60 = vshrl.u32 %v1128_v46, 16 }
  0xfe   : > { %v767_v51 = vld [vmem:[#allocation2 + $0x38] sm:$0x1]  ;;  %v929_v59 = vld [vmem:[#allocation2 + $0x34] sm:$0xf]  ;;  %v1172_v61 = vshll.u32 %v1128_v46, 16  ;;  %v947_v62 = vshll.u32 %v923_v23, 16  ;;  %v976_v12 = vsel %vm2417_vm12, %v2111_v26, %v975_v53 }
  0xff   : > { %v952_v0 = vshrl.u32 %v924_v48, 16  ;;  %v1542_v1 = vshll.u32 %v1493_v49, 16  ;;  %v716_v2 = vld [vmem:[#allocation2 + $0x58] sm:$0xf]  ;;  %v1192_v3 = vshll.u32 %v1131_v50, 16  ;;  %v843_v4 = vshll.u32 %v767_v51, 16 }
 0x100   : > { %1459 = vrot.lane.b32.xlu0 %v1441_v19, %s2310_s17  ;;  %v763_v5 = vld [vmem:[#allocation2 + $0x20] sm:$0x1]  ;;  %v949_v6 = vor.u32 %v947_v62, %v946_v54  ;;  %v983_v8 = vshrl.u32 %v929_v59, 16  ;;  %v2511_v9 = vrot.slane %v801_v47, 5  ;;  %v1164_v10 = vshll.u32 %v1127_v56, 16 }
 0x101   : > { %729 = vrot.lane.b32.xlu1 %v711_v18, %s2311_s18  ;;  %v826_v13 = vor.u32 %v825_v58, %v822_v55  ;;  %v1171_v14 = vrot.slane %v1169_v60, 4  ;;  %v1174_v15 = vrot.slane %v1172_v61, 5  ;;  %v1291_v16 = vld [vmem:[#allocation2 + $0x34] sm:$0xf]  ;;  %v1490_v17 = vld [vmem:[#allocation2 + $0x28] sm:$0xf] }
 0x102   : > { %v2517_v18 = vrot.slane %v1303_v63, 11  ;;  %v2519_v19 = vrot.slane %v952_v0, 11  ;;  %v2521_v20 = vrot.slane %v1542_v1, 5  ;;  %v815_v21 = vshll.u32 %v763_v5, 16  ;;  %v1489_v11 = vld [vmem:[#allocation2 + $0x20] sm:$0x1] }
 0x103   : > { %v2523_v22 = vrot.slane %v1192_v3, 5  ;;  %v2525_v23 = vrot.slane %v843_v4, 5  ;;  %v1444_v25 = vld [vmem:[#allocation2 + $0x58] sm:$0xf]  ;;  %v950_v26 = vsel %vm2417_vm12, %v2491_v27, %v949_v6  ;;  %v985_v30 = vrot.slane %v983_v8, 7 }
 0x104   : > { %733 = vrot.lane.b32.xlu0 %v713_v40, %s2311_s18  ;;  %v1334_v35 = vshrl.u32 %v1291_v16, 16  ;;  %v2530_v36 = vrot.slane %v1164_v10, 5  ;;  %v827_v37 = vrot.slane %v826_v13, 4  ;;  %v1175_v38 = vor.u32 %v1174_v15, %v1171_v14  ;;  %v1124_v41 = vld [vmem:[#allocation2 + $0x10] sm:$0xf] }
 0x105   : > { %1093 = vrot.lane.b32.xlu1 %v1076_v39, %s2314_s23  ;;  %v1519_v39 = vshrl.u32 %v1490_v17, 16  ;;  %v1522_v40 = vshll.u32 %v1490_v17, 16  ;;  %v986_v42 = vshll.u32 %v929_v59, 16  ;;  %v2534_v44 = vrot.slane %v815_v21, 5  ;;  %v1296_v47 = vld [vmem:[#allocation2 + $0x54] sm:$0x8] }
 0x106   : > { %v1514_v45 = vshll.u32 %v1489_v11, 16  ;;  %v629_v46 = vshrl.u32 %v577_v24, 16  ;;  %v1292_v27 = vld [vmem:[#allocation2 + $0x3c] sm:$0x8]  ;;  %v934_v48 = vld [vmem:[#allocation2 + $0x54] sm:$0x8]  ;;  %v832_v54 = vsel %vm2421_vm13, %v827_v37, %v2493_v29 }
 0x107   : > { %v1081_v49 = vld [vmem:[#allocation2 + $0x58] sm:$0xf]  ;;  %v988_v50 = vor.u32 %v986_v42, %v985_v30  ;;  %v1336_v51 = vrot.slane %v1334_v35, 7  ;;  %v1144_v53 = vshll.u32 %v1124_v41, 16  ;;  %v1176_v55 = vrot.slane %v1175_v38, 4 }
 0x108   : > { %1455 = vrot.lane.b32.xlu0 %v1439_v52, %s2310_s17  ;;  %v1141_v52 = vshrl.u32 %v1124_v41, 16  ;;  %v1521_v56 = vrot.slane %v1519_v39, 4  ;;  %v760_v58 = vld [vmem:[#allocation2 + $0x10] sm:$0xf]  ;;  %v1337_v59 = vshll.u32 %v1291_v16, 16  ;;  %v1368_v60 = vshrl.u32 %v1296_v47, 16 }
 0x109   : > { %1408 = vrot.lane.b32.xlu1 %v1327_v57, %s2313_s20  ;;  %v1524_v57 = vrot.slane %v1522_v40, 5  ;;  %v1342_v61 = vshrl.u32 %v1292_v27, 16  ;;  %v2541_v62 = vrot.slane %v629_v46, 11  ;;  %v2543_v63 = vrot.slane %v1514_v45, 5  ;;  %v936_v1 = vld [vmem:[#allocation2 + $0x60] sm:$0x8] }
 0x10a   : > { %v1017_v0 = vshrl.u32 %v934_v48, 16  ;;  %v989_v29 = vsel %vm2417_vm12, %v2495_v31, %v988_v50  ;;  %v1339_v3 = vor.u32 %v1337_v59, %v1336_v51  ;;  %v1143_v4 = vrot.slane %v1141_v52, 4  ;;  %v1298_v6 = vld [vmem:[#allocation2 + $0x60] sm:$0x8]  ;;  %v1287_v14 = vld [vmem:[#allocation2 + $0x1c] sm:$0xf] }
 0x10b   : > { %v792_v5 = vshrl.u32 %v760_v58, 16  ;;  %v1181_v8 = vsel %vm2421_vm13, %v1176_v55, %v2497_v32  ;;  %v1525_v10 = vor.u32 %v1524_v57, %v1521_v56  ;;  %v795_v13 = vshll.u32 %v760_v58, 16  ;;  %v2559_v24 = vld [vmem:[#allocation2 + $0x48] sm:$0x8]  ;;  %v1492_v30 = vld [vmem:[#allocation2 + $0x34] sm:$0xf] }
 0x10c   : > { %1046 = vrot.lane.b32.xlu0 %v976_v12, %s2315_s24  ;;  %v1146_v12 = vrot.slane %v1144_v53, 5  ;;  %v2553_v15 = vrot.slane %v1368_v60, 11  ;;  %v2555_v31 = vrot.slane %v1342_v61, 11  ;;  %v1030_v16 = vshrl.u32 %v936_v1, 16  ;;  %v2561_v32 = vld [vmem:[#allocation2 + $0x48] sm:$0x8] }
 0x10d   : > { %739 = vrot.lane.b32.xlu1 %v716_v2, %s2311_s18  ;;  %v930_v2 = vld [vmem:[#allocation2 + $0x3c] sm:$0x8]  ;;  %v2557_v21 = vrot.slane %v1017_v0, 11  ;;  %v1381_v11 = vshrl.u32 %v1298_v6, 16  ;;  %v2563_v35 = vld [vmem:[#allocation2 + $0x5c] sm:$0x1]  ;;  %v1340_v38 = vsel %vm2417_vm12, %v2499_v33, %v1339_v3 }
 0x10e   : > { %v991_v17 = vshrl.u32 %v930_v2, 16  ;;  %v1442_v37 = vld [vmem:[#allocation2 + $0x40] sm:$0xf]  ;;  %v1526_v39 = vrot.slane %v1525_v10, 4  ;;  %v1147_v40 = vor.u32 %v1146_v12, %v1143_v4  ;;  %v797_v41 = vrot.slane %v795_v13, 5 }
 0x10f   : > { %v2568_v42 = vld [vmem:[#allocation2 + $0x5c] sm:$0x1]  ;;  %v2572_v46 = vrot.slane %v1030_v16, 11  ;;  %v1004_v27 = vshrl.u32 %v2559_v24, 16  ;;  %v1355_v48 = vshrl.u32 %v2561_v32, 16  ;;  %v1536_v33 = vshll.u32 %v1492_v30, 16 }
 0x110   : > { %1042 = vrot.lane.b32.xlu0 %v950_v26, %s2315_s24  ;;  %v1308_v26 = vshrl.u32 %v1287_v14, 16  ;;  %v925_v45 = vld [vmem:[#allocation2 + $0x1c] sm:$0xf]  ;;  %v2574_v47 = vrot.slane %v991_v17, 11  ;;  %v1130_v50 = vld [vmem:[#allocation2 + $0x34] sm:$0xf]  ;;  %v1531_v56 = vsel %vm2421_vm13, %v1526_v39, %v2501_v7 }
 0x111   : > { %1465 = vrot.lane.b32.xlu1 %v1444_v25, %s2310_s17  ;;  %v794_v25 = vrot.slane %v792_v5, 4  ;;  %v573_v51 = vld [vmem:[#allocation2 + $0xc] sm:$0x8]  ;;  %v885_v53 = vshll.u32 %v2563_v35, 16  ;;  %v2580_v55 = vrot.slane %v1381_v11, 11  ;;  %v1148_v58 = vrot.slane %v1147_v40, 4 }
 0x112   : > { %v1310_v52 = vrot.slane %v1308_v26, 7  ;;  %v1079_v57 = vld [vmem:[#allocation2 + $0x40] sm:$0xf]  ;;  %v957_v60 = vshrl.u32 %v925_v45, 16  ;;  %v766_v61 = vld [vmem:[#allocation2 + $0x34] sm:$0xf] }
 0x113   : > { %v798_v59 = vor.u32 %v797_v41, %v794_v25  ;;  %v1311_v0 = vshll.u32 %v1287_v14, 16  ;;  %v1183_v1 = vshrl.u32 %v1130_v50, 16  ;;  %v1186_v2 = vshll.u32 %v1130_v50, 16  ;;  %v575_v5 = vld [vmem:[#allocation2 + $0x18] sm:$0x8] }
 0x114   : > { %1103 = vrot.lane.b32.xlu0 %v1081_v49, %s2314_s23  ;;  %v1533_v49 = vshrl.u32 %v1492_v30, 16  ;;  %v1538_v4 = vrot.slane %v1536_v33, 5  ;;  %v579_v6 = vld [vmem:[#allocation2 + $0x30] sm:$0x8]  ;;  %v834_v7 = vshrl.u32 %v766_v61, 16  ;;  %v837_v10 = vshll.u32 %v766_v61, 16 }
 0x115   : > { %895 = vrot.lane.b32.xlu1 %v832_v54, %s2312_s19  ;;  %v1584_v54 = vshll.u32 %v2568_v42, 16  ;;  %v585_v12 = vld [vmem:[#allocation2 + $0x54] sm:$0x8]  ;;  %v581_v13 = vld [vmem:[#allocation2 + $0x3c] sm:$0x8]  ;;  %v1153_v17 = vsel %vm2421_vm13, %v1148_v58, %v2503_v43  ;;  %v799_v11 = vrot.slane %v798_v59, 4 }
 0x116   : > { %v1535_v3 = vrot.slane %v1533_v49, 4  ;;  %v714_v16 = vld [vmem:[#allocation2 + $0x40] sm:$0xf]  ;;  %v959_v25 = vrot.slane %v957_v60, 7  ;;  %v2590_v14 = vld [vmem:[#allocation2 + $0x5c] sm:$0x1] }
 0x117   : > { %v583_v26 = vld [vmem:[#allocation2 + $0x48] sm:$0x8]  ;;  %v1185_v30 = vrot.slane %v1183_v1, 4  ;;  %v616_v39 = vshrl.u32 %v575_v5, 16  ;;  %v642_v40 = vshrl.u32 %v579_v6, 16  ;;  %v960_v41 = vshll.u32 %v925_v45, 16 }
 0x118   : > { %1256 = vrot.lane.b32.xlu0 %v1181_v8, %s2316_s25  ;;  %v1313_v8 = vor.u32 %v1311_v0, %v1310_v52  ;;  %v1539_v49 = vor.u32 %v1538_v4, %v1535_v3  ;;  %v2594_v33 = vld [vmem:[#allocation2 + $0x44] sm:$0x1]  ;;  %v681_v50 = vshrl.u32 %v585_v12, 16  ;;  %v655_v43 = vshrl.u32 %v581_v13, 16  ;;  %v762_v1 = vld [vmem:[#allocation2 + $0x1c] sm:$0xf] }
 0x119   : > { %1048 = vrot.lane.b32.xlu1 %v989_v29, %s2315_s24  ;;  %v603_v29 = vshrl.u32 %v573_v51, 16  ;;  %v836_v52 = vrot.slane %v834_v7, 4  ;;  %v668_v58 = vshrl.u32 %v583_v26, 16  ;;  %v804_v59 = vsel %vm2421_vm13, %v799_v11, %v2511_v9  ;;  %v578_v6 = vld [vmem:[#allocation2 + $0x28] sm:$0xf]  ;;  %v2291_v42 = vld [vmem:[%s2980_s2] sm:$0xff]  }
 0x11a   : > { %v1314_v51 = vsel %vm2417_vm12, %v2517_v18, %v1313_v8  ;;  %v962_v60 = vor.u32 %v960_v41, %v959_v25  ;;  %v1556_v18 = vshll.u32 %v2594_v33, 16  ;;  %v1540_v4 = vrot.slane %v1539_v49, 4  ;;  %v1445_v7 = vld [vmem:[#allocation2 + $0x64] sm:$0xf]  ;;  %v2625_v26 = vld [vmem:[#allocation2 + $0x40] sm:$0xf]  ;;  %2207 = vmatprep.subr.bf16.mxu1 %v2291_v42 }
 0x11b   : > { %v2606_v3 = vrot.slane %v603_v29, 11  ;;  %v2608_v8 = vrot.slane %v616_v39, 11  ;;  %v2610_v9 = vrot.slane %v642_v40, 11  ;;  %v2612_v12 = vrot.slane %v681_v50, 11  ;;  %v574_v39 = vld [vmem:[#allocation2 + $0x10] sm:$0xf]  ;;  %2208 = vmatpush3.bf16.msra.mxu1 %v2291_v42 }
 0x11c   : > { %1410 = vrot.lane.b32.xlu0 %v1340_v38, %s2313_s20  ;;  %v1126_v38 = vld [vmem:[#allocation2 + $0x1c] sm:$0xf]  ;;  %v2614_v13 = vrot.slane %v655_v43, 11  ;;  %v963_v29 = vsel %vm2417_vm12, %v2519_v19, %v962_v60  ;;  %v806_v25 = vshrl.u32 %v762_v1, 16  ;;  %v1545_v40 = vsel %vm2421_vm13, %v1540_v4, %v2521_v20  ;;  %v1082_v50 = vld [vmem:[#allocation2 + $0x64] sm:$0xf] }
 0x11d   : > { %1461 = vrot.lane.b32.xlu1 %v1442_v37, %s2310_s17  ;;  %v1188_v37 = vrot.slane %v1186_v2, 5  ;;  %v1155_v61 = vshrl.u32 %v1126_v38, 16  ;;  %v1158_v45 = vshll.u32 %v1126_v38, 16  ;;  %v1234_v2 = vshll.u32 %v2590_v14, 16  ;;  %v2292_v14 = vld [vmem:[%s2980_s2 + $0x8] sm:$0xff]  }
 0x11e   : > { %v634_v38 = vshrl.u32 %v578_v6, 16  ;;  %v809_v49 = vshll.u32 %v762_v1, 16  ;;  %v772_v1 = vld [vmem:[#allocation2 + $0x58] sm:$0xf]  ;;  %2209 = vmatprep.subr.bf16.mxu1 %v2292_v14 }
 0x11f   : > { %v1189_v0 = vor.u32 %v1188_v37, %v1185_v30  ;;  %v2623_v11 = vrot.slane %v1158_v45, 5  ;;  %v1488_v37 = vld [vmem:[#allocation2 + $0x1c] sm:$0xf]  ;;  %2210 = vmatpush3.bf16.msra.mxu1 %v2292_v14 }
 0x120   : > { %1099 = vrot.lane.b32.xlu0 %v1079_v57, %s2314_s23  ;;  %v1297_v57 = vld [vmem:[#allocation2 + $0x58] sm:$0xf]  ;;  %v1505_v60 = vshrl.u32 %v1488_v37, 16  ;;  %v576_v45 = vld [vmem:[#allocation2 + $0x1c] sm:$0xf] }
 0x121   : > { %1618 = vrot.lane.b32.xlu1 %v1531_v56, %s2317_s26  ;;  %v839_v56 = vrot.slane %v837_v10, 5  ;;  %v1373_v5 = vshrl.u32 %v1297_v57, 16  ;;  %v1190_v30 = vrot.slane %v1189_v0, 4  ;;  %v1376_v41 = vshll.u32 %v1297_v57, 16 }
 0x122   : > { %v1350_v57 = vshll.u32 %v2625_v26, 16  ;;  %v1508_v0 = vshll.u32 %v1488_v37, 16  ;;  %v2651_v37 = vrot.slane %v1505_v60, 4 }
 0x123   : > { %v840_v10 = vor.u32 %v839_v56, %v836_v52  ;;  %v1375_v19 = vrot.slane %v1373_v5, 7  ;;  %v636_v52 = vrot.slane %v634_v38, 7  ;;  %v637_v56 = vshll.u32 %v578_v6, 16  ;;  %v580_v5 = vld [vmem:[#allocation2 + $0x34] sm:$0xf] }
 0x124   : > { %1252 = vrot.lane.b32.xlu0 %v1153_v17, %s2316_s25  ;;  %v2621_v17 = vrot.slane %v1155_v61, 4  ;;  %v608_v61 = vshrl.u32 %v574_v39, 16  ;;  %v1195_v20 = vsel %vm2421_vm13, %v1190_v30, %v2523_v22  ;;  %v621_v30 = vshrl.u32 %v576_v45, 16 }
 0x125   : > { %735 = vrot.lane.b32.xlu1 %v714_v16, %s2311_s18  ;;  %v2616_v16 = vrot.slane %v668_v58, 11  ;;  %v841_v43 = vrot.slane %v840_v10, 4  ;;  %v639_v4 = vor.u32 %v637_v56, %v636_v52  ;;  %v2643_v6 = vor.u32 %v1376_v41, %v1375_v19 }
 0x126   : > { %v1161_v58 = vor.u32 %v2623_v11, %v2621_v17  ;;  %v610_v10 = vrot.slane %v608_v61, 7  ;;  %v586_v17 = vld [vmem:[#allocation2 + $0x58] sm:$0xf]  ;;  %v715_v11 = vld [vmem:[#allocation2 + $0x4c] sm:$0xf]  ;;  %v647_v41 = vshrl.u32 %v580_v5, 16 }
 0x127   : > { %v640_v22 = vsel %vm2417_vm12, %v2541_v62, %v639_v4  ;;  %v650_v56 = vshll.u32 %v580_v5, 16  ;;  %v689_v60 = vshll.u32 %v586_v17, 16  ;;  %v879_v61 = vshll.u32 %v772_v1, 16 }
 0x128   : > { %1406 = vrot.lane.b32.xlu0 %v1314_v51, %s2313_s20  ;;  %v1347_v51 = vshrl.u32 %v2625_v26, 16  ;;  %704 = vst.msk [vmem:[#allocation3 + $0xc] sm:$0xf] %vm340_vm2, %v640_v22  ;;  %v649_v52 = vrot.slane %v647_v41, 7 }
 0x129   : > { %891 = vrot.lane.b32.xlu1 %v804_v59, %s2312_s19  ;;  %v2635_v59 = vrot.slane %v806_v25, 4  ;;  %v846_v25 = vsel %vm2421_vm13, %v841_v43, %v2525_v23  ;;  %v623_v23 = vrot.slane %v621_v30, 7  ;;  %v686_v43 = vshrl.u32 %v586_v17, 16 }
 0x12a   : > { %v1349_v38 = vrot.slane %v1347_v51, 7  ;;  %v2656_v51 = vld [vmem:[#allocation2 + $0x58] sm:$0xf]  ;;  %v652_v22 = vor.u32 %v650_v56, %v649_v52 }
 0x12b   : > { %v1136_v52 = vld [vmem:[#allocation2 + $0x58] sm:$0xf] }
 0x12c   : > { %1467 = vrot.lane.b32.xlu0 %v1445_v7, %s2310_s17  ;;  %v811_v7 = vrot.slane %v809_v49, 5  ;;  %v1510_v49 = vrot.slane %v1508_v0, 5  ;;  %v1080_v0 = vld [vmem:[#allocation2 + $0x4c] sm:$0xf] }
 0x12d   : > { %1044 = vrot.lane.b32.xlu1 %v963_v29, %s2315_s24  ;;  %v611_v29 = vshll.u32 %v574_v39, 16  ;;  %v582_v39 = vld [vmem:[#allocation2 + $0x40] sm:$0xf] }
 0x12e   : > { %v663_v30 = vshll.u32 %v582_v39, 16  ;;  %v1511_v41 = vor.u32 %v1510_v49, %v2651_v37  ;;  %v1352_v49 = vor.u32 %v1350_v57, %v1349_v38  ;;  %v1225_v38 = vshrl.u32 %v1136_v52, 16 }
 0x12f   : > { %v613_v19 = vor.u32 %v611_v29, %v610_v10  ;;  %v660_v10 = vshrl.u32 %v582_v39, 16  ;;  %v584_v29 = vld [vmem:[#allocation2 + $0x4c] sm:$0xf]  ;;  %v2676_v39 = vld [vmem:[#allocation2 + $0x40] sm:$0xf] }
 0x130   : > { %1620 = vrot.lane.b32.xlu0 %v1545_v40, %s2317_s26  ;;  %v876_v40 = vshrl.u32 %v772_v1, 16 }
 0x131   : > { %1105 = vrot.lane.b32.xlu1 %v1082_v50, %s2314_s23  ;;  %v624_v50 = vshll.u32 %v576_v45, 16  ;;  %v614_v62 = vsel %vm2417_vm12, %v2606_v3, %v613_v19  ;;  %v812_v45 = vor.u32 %v811_v7, %v2635_v59  ;;  %v662_v17 = vrot.slane %v660_v10, 7 }
 0x132   : > { %702 = vst.msk [vmem:[#allocation3 + $0x4] sm:$0xf] %vm340_vm2, %v614_v62  ;;  %v878_v3 = vrot.slane %v876_v40, 4  ;;  %v1022_v19 = vshrl.u32 %v2656_v51, 16  ;;  %v673_v59 = vshrl.u32 %v584_v29, 16  ;;  %v676_v7 = vshll.u32 %v584_v29, 16 }
 0x133   : > { %v626_v4 = vor.u32 %v624_v50, %v623_v23  ;;  %v2674_v40 = vld [vmem:[#allocation2 + $0x64] sm:$0xf]  ;;  %v665_v23 = vor.u32 %v663_v30, %v662_v17  ;;  %v1443_v50 = vld [vmem:[#allocation2 + $0x4c] sm:$0xf]  ;;  %v1498_v62 = vld [vmem:[#allocation2 + $0x58] sm:$0xf] }
 0x134   : > { %737 = vrot.lane.b32.xlu0 %v715_v11, %s2311_s18  ;;  %v1162_v11 = vrot.slane %v1161_v58, 4  ;;  %v653_v58 = vsel %vm2417_vm12, %v2610_v9, %v652_v22  ;;  %v675_v37 = vrot.slane %v673_v59, 7  ;;  %v1512_v10 = vrot.slane %v1511_v41, 4  ;;  %v2704_v29 = vld [vmem:[#allocation2 + $0x44] sm:$0x1] }
 0x135   : > { %1258 = vrot.lane.b32.xlu1 %v1195_v20, %s2316_s25  ;;  %v688_v20 = vrot.slane %v686_v43, 7  ;;  %v627_v1 = vsel %vm2417_vm12, %v2608_v8, %v626_v4  ;;  %705 = vst.msk [vmem:[#allocation3 + $0x10] sm:$0xf] %vm340_vm2, %v653_v58  ;;  %v813_v43 = vrot.slane %v812_v45, 4  ;;  %v666_v56 = vsel %vm2417_vm12, %v2614_v13, %v665_v23  ;;  %v2706_v13 = vld [vmem:[#allocation2 + $0x44] sm:$0x1] }
 0x136   : > { %703 = vst.msk [vmem:[#allocation3 + $0x8] sm:$0xf] %vm340_vm2, %v627_v1  ;;  %v1167_v9 = vsel %vm2421_vm13, %v1162_v11, %v2530_v36  ;;  %v1025_v36 = vshll.u32 %v2656_v51, 16  ;;  %v996_v4 = vshrl.u32 %v2676_v39, 16  ;;  %706 = vst.msk [vmem:[#allocation3 + $0x14] sm:$0xf] %vm340_vm2, %v666_v56  ;;  %v1353_v11 = vsel %vm2417_vm12, %v2555_v31, %v1352_v49 }
 0x137   : > { %v691_v5 = vor.u32 %v689_v60, %v688_v20  ;;  %v1024_v60 = vrot.slane %v1022_v19, 7  ;;  %v678_v20 = vor.u32 %v676_v7, %v675_v37  ;;  %v1578_v26 = vshll.u32 %v1498_v62, 16  ;;  %v1494_v30 = vld [vmem:[#allocation2 + $0x40] sm:$0xf] }
 0x138   : > { %897 = vrot.lane.b32.xlu0 %v846_v25, %s2312_s19  ;;  %v881_v25 = vrot.slane %v879_v61, 5  ;;  %v1035_v61 = vshrl.u32 %v2674_v40, 16  ;;  %v818_v57 = vsel %vm2421_vm13, %v813_v43, %v2534_v44  ;;  %v1228_v51 = vshll.u32 %v1136_v52, 16  ;;  %v768_v17 = vld [vmem:[#allocation2 + $0x40] sm:$0xf] }
 0x139   : > { %1101 = vrot.lane.b32.xlu1 %v1080_v0, %s2314_s23  ;;  %v692_v8 = vsel %vm2417_vm12, %v2612_v12, %v691_v5  ;;  %v1379_v12 = vsel %vm2417_vm12, %v2553_v15, %v2643_v6  ;;  %v1575_v6 = vshrl.u32 %v1498_v62, 16  ;;  %v679_v0 = vsel %vm2417_vm12, %v2616_v16, %v678_v20  ;;  %v1132_v58 = vld [vmem:[#allocation2 + $0x40] sm:$0xf] }
 0x13a   : > { %708 = vst.msk [vmem:[#allocation3 + $0x1c] sm:$0xf] %vm340_vm2, %v692_v8  ;;  %v882_v15 = vor.u32 %v881_v25, %v878_v3  ;;  %v887_v44 = vrot.slane %v885_v53, 5  ;;  %v1038_v45 = vshll.u32 %v2674_v40, 16  ;;  %v2721_v22 = vrot.slane %v1584_v54, 5 }
 0x13b   : > { %707 = vst.msk [vmem:[#allocation3 + $0x18] sm:$0xf] %vm340_vm2, %v679_v0  ;;  %v1027_v16 = vor.u32 %v1025_v36, %v1024_v60  ;;  %v1037_v3 = vrot.slane %v1035_v61, 7  ;;  %v998_v1 = vrot.slane %v996_v4, 7  ;;  %v999_v5 = vshll.u32 %v2676_v39, 16 }
 0x13c   : > { %1463 = vrot.lane.b32.xlu0 %v1443_v50, %s2310_s17  ;;  %v1517_v31 = vsel %vm2421_vm13, %v1512_v10, %v2543_v63  ;;  %v883_v35 = vrot.slane %v882_v15, 4  ;;  %v1577_v53 = vrot.slane %v1575_v6, 4  ;;  %v1580_v19 = vrot.slane %v1578_v26, 5  ;;  %v2733_v25 = vld [vmem:[#allocation2 + $0x64] sm:$0xf] }
 0x13d   : > { %1254 = vrot.lane.b32.xlu1 %v1167_v9, %s2316_s25  ;;  %v1227_v54 = vrot.slane %v1225_v38, 4  ;;  %v1230_v59 = vrot.slane %v1228_v51, 5  ;;  %v1547_v7 = vshrl.u32 %v1494_v30, 16  ;;  %v1550_v41 = vshll.u32 %v1494_v30, 16  ;;  %v2758_v15 = vld [vmem:[#allocation2 + $0x4c] sm:$0xf] }
 0x13e   : > { %v848_v40 = vshrl.u32 %v768_v17, 16  ;;  %v851_v63 = vshll.u32 %v768_v17, 16  ;;  %v857_v39 = vshll.u32 %v2704_v29, 16  ;;  %v1206_v8 = vshll.u32 %v2706_v13, 16  ;;  %v2760_v6 = vld [vmem:[#allocation2 + $0x4c] sm:$0xf] }
 0x13f   : > { %v1040_v23 = vor.u32 %v1038_v45, %v1037_v3  ;;  %v1236_v9 = vrot.slane %v1234_v2, 5  ;;  %v1197_v50 = vshrl.u32 %v1132_v58, 16  ;;  %v1200_v43 = vshll.u32 %v1132_v58, 16  ;;  %v2293_v13 = vld [vmem:[%s2980_s2 + $0x10] ss:$0 sps:$4 sm:$0x33]  }
 0x140   : > { %893 = vrot.lane.b32.xlu0 %v818_v57, %s2312_s19  ;;  %v888_v62 = vsel %vm2421_vm13, %v883_v35, %v887_v44  ;;  %v1028_v37 = vsel %vm2417_vm12, %v2557_v21, %v1027_v16  ;;  %v1581_v49 = vor.u32 %v1580_v19, %v1577_v53  ;;  %v1231_v36 = vor.u32 %v1230_v59, %v1227_v54  ;;  %v770_v57 = vld [vmem:[#allocation2 + $0x4c] sm:$0xf]  ;;  %v1139_v53 = vld [vmem:[#allocation2 + $0x68] sm:$0x1]  ;;  %v771_v19 = vld [vmem:[#allocation2 + $0x50] sm:$0x1] }
 0x141   : > { %1416 = vrot.lane.b32.xlu1 %v1379_v12, %s2313_s20  ;;  %v1001_v12 = vor.u32 %v999_v5, %v998_v1  ;;  %v1549_v52 = vrot.slane %v1547_v7, 4  ;;  %v1552_v56 = vrot.slane %v1550_v41, 5  ;;  %v1386_v60 = vshrl.u32 %v2733_v25, 16  ;;  %v1134_v58 = vld [vmem:[#allocation2 + $0x4c] sm:$0xf] }
 0x142   : > { %v2752_v2 = vrot.slane %v1556_v18, 5  ;;  %v850_v21 = vrot.slane %v848_v40, 4  ;;  %v853_v61 = vrot.slane %v851_v63, 5  ;;  %v2756_v4 = vrot.slane %v1004_v27, 11  ;;  %v1138_v27 = vld [vmem:[#allocation2 + $0x64] sm:$0xf] }
 0x143   : > { %v1199_v20 = vrot.slane %v1197_v50, 4  ;;  %v1202_v10 = vrot.slane %v1200_v43, 5  ;;  %v1041_v26 = vsel %vm2417_vm12, %v2572_v46, %v1040_v23  ;;  %v1002_v33 = vsel %vm2417_vm12, %v2574_v47, %v1001_v12  ;;  %v1496_v41 = vld [vmem:[#allocation2 + $0x4c] sm:$0xf] }
 0x144   : > { %1616 = vrot.lane.b32.xlu0 %v1517_v31, %s2317_s26  ;;  %v1582_v18 = vrot.slane %v1581_v49, 4  ;;  %v1389_v24 = vshll.u32 %v2733_v25, 16  ;;  %v1232_v38 = vrot.slane %v1231_v36, 4  ;;  %v1553_v51 = vor.u32 %v1552_v56, %v1549_v52 }
 0x145   : > { %1412 = vrot.lane.b32.xlu1 %v1353_v11, %s2313_s20  ;;  %v1388_v29 = vrot.slane %v1386_v60, 7  ;;  %vm1717_vm2 = vcmask 1041408   ;;  %v854_v46 = vor.u32 %v853_v61, %v850_v21  ;;  %v1009_v47 = vshrl.u32 %v2758_v15, 16  ;;  %v1500_v60 = vld [vmem:[#allocation2 + $0x64] sm:$0xf] }
 0x146   : > { %v2777_v0 = vrot.slane %v1355_v48, 11  ;;  %v1360_v11 = vshrl.u32 %v2760_v6, 16  ;;  %v1203_v44 = vor.u32 %v1202_v10, %v1199_v20  ;;  %v1239_v45 = vshrl.u32 %v1138_v27, 16  ;;  %2266 = vmatprep.subr.msk.bf16.mxu1 %vm1717_vm2, %v2293_v13 }
 0x147   : > { %v1242_v30 = vshll.u32 %v1138_v27, 16  ;;  %v1719_v16 = vsel %vm1717_vm2, %v2293_v13, 0  ;;  %v859_v3 = vrot.slane %v857_v39, 5  ;;  %v1208_v1 = vrot.slane %v1206_v8, 5  ;;  %v1502_v39 = vld [vmem:[#allocation2 + $0x70] sm:$0xf] }
 0x148   : > { %1054 = vrot.lane.b32.xlu0 %v1028_v37, %s2315_s24  ;;  %v862_v5 = vshrl.u32 %v770_v57, 16  ;;  %v865_v17 = vshll.u32 %v770_v57, 16  ;;  %2212 = vmatpush3.bf16.msra.mxu1 %v1719_v16  ;;  %v1587_v32 = vsel %vm2421_vm13, %v1582_v18, %v2721_v22  ;;  %v1237_v48 = vsel %vm2421_vm13, %v1232_v38, %v1236_v9  ;;  %v1503_v16 = vld [vmem:[#allocation2 + $0x74] sm:$0x1] }
 0x149   : > { %903 = vrot.lane.b32.xlu1 %v888_v62, %s2312_s19  ;;  %v1554_v31 = vrot.slane %v1553_v51, 4  ;;  %v1391_v35 = vor.u32 %v1389_v24, %v1388_v29  ;;  %v855_v42 = vrot.slane %v854_v46, 4  ;;  %v1011_v54 = vrot.slane %v1009_v47, 7 }
 0x14a   : > { %v1012_v59 = vshll.u32 %v2758_v15, 16  ;;  %v1363_v7 = vshll.u32 %v2760_v6, 16  ;;  %v1204_v22 = vrot.slane %v1203_v44, 4  ;;  %v1362_v25 = vrot.slane %v1360_v11, 7  ;;  %v2811_v44 = vpop.permute.xlu1 %1469 }
 0x14b   : > { %v1241_v40 = vrot.slane %v1239_v45, 4  ;;  %v1244_v63 = vrot.slane %v1242_v30, 5  ;;  %v864_v8 = vrot.slane %v862_v5, 4  ;;  %v867_v23 = vrot.slane %v865_v17, 5  ;;  %v1501_v5 = vld [vmem:[#allocation2 + $0x68] sm:$0x1] }
 0x14c   : > { %1050 = vrot.lane.b32.xlu0 %v1002_v33, %s2315_s24  ;;  %v1211_v9 = vshrl.u32 %v1134_v58, 16  ;;  %v1214_v50 = vshll.u32 %v1134_v58, 16  ;;  %v1559_v43 = vsel %vm2421_vm13, %v1554_v31, %v2752_v2  ;;  %v1392_v62 = vsel %vm2417_vm12, %v2580_v55, %v1391_v35  ;;  %v1135_v55 = vld [vmem:[#allocation2 + $0x50] sm:$0x1] }
 0x14d   : > { %1056 = vrot.lane.b32.xlu1 %v1041_v26, %s2315_s24  ;;  %v1561_v37 = vshrl.u32 %v1496_v41, 16  ;;  %v1564_v12 = vshll.u32 %v1496_v41, 16  ;;  %v1248_v49 = vshll.u32 %v1139_v53, 16  ;;  %v871_v36 = vshll.u32 %v771_v19, 16  ;;  %v1497_v26 = vld [vmem:[#allocation2 + $0x50] sm:$0x1] }
 0x14e   : > { %v1603_v52 = vshrl.u32 %v1502_v39, 16  ;;  %v1606_v56 = vshll.u32 %v1502_v39, 16  ;;  %v860_v14 = vsel %vm2421_vm13, %v855_v42, %v859_v3  ;;  %v1209_v2 = vsel %vm2421_vm13, %v1204_v22, %v1208_v1 }
 0x14f   : > { %v1014_v21 = vor.u32 %v1012_v59, %v1011_v54  ;;  %v1365_v61 = vor.u32 %v1363_v7, %v1362_v25  ;;  %v1245_v20 = vor.u32 %v1244_v63, %v1241_v40  ;;  %v868_v10 = vor.u32 %v867_v23, %v864_v8  ;;  %v2821_v54 = vpop.permute.xlu1 %1420 }
 0x150   : > { %1264 = vrot.lane.b32.xlu0 %v1237_v48, %s2316_s25  ;;  %v1213_v15 = vrot.slane %v1211_v9, 4  ;;  %v1216_v6 = vrot.slane %v1214_v50, 5  ;;  %v1563_v33 = vrot.slane %v1561_v37, 4  ;;  %v1566_v18 = vrot.slane %v1564_v12, 5 }
 0x151   : > { %1626 = vrot.lane.b32.xlu1 %v1587_v32, %s2317_s26  ;;  %v1589_v24 = vshrl.u32 %v1500_v60, 16  ;;  %v1592_v27 = vshll.u32 %v1500_v60, 16  ;;  %v1250_v57 = vrot.slane %v1248_v49, 5  ;;  %v1220_v38 = vshll.u32 %v1135_v55, 16 }
 0x152   : > { %v873_v51 = vrot.slane %v871_v36, 5  ;;  %v1570_v29 = vshll.u32 %v1497_v26, 16  ;;  %v1605_v13 = vrot.slane %v1603_v52, 4  ;;  %v1608_v46 = vrot.slane %v1606_v56, 5 }
 0x153   : > { %v1015_v47 = vsel %vm2417_vm12, %v2756_v4, %v1014_v21  ;;  %v1366_v11 = vsel %vm2417_vm12, %v2777_v0, %v1365_v61  ;;  %v1246_v45 = vrot.slane %v1245_v20, 4  ;;  %v869_v30 = vrot.slane %v868_v10, 4 }
 0x154   : > { %1418 = vrot.lane.b32.xlu0 %v1392_v62, %s2313_s20  ;;  %v1217_v3 = vor.u32 %v1216_v6, %v1213_v15  ;;  %v1567_v1 = vor.u32 %v1566_v18, %v1563_v33  ;;  %v1591_v17 = vrot.slane %v1589_v24, 4  ;;  %v1594_v32 = vrot.slane %v1592_v27, 5 }
 0x155   : > { %1622 = vrot.lane.b32.xlu1 %v1559_v43, %s2317_s26  ;;  %v1609_v48 = vor.u32 %v1608_v46, %v1605_v13  ;;  %v1612_v4 = vshll.u32 %v1503_v16, 16  ;;  %v1251_v28 = vsel %vm2421_vm13, %v1246_v45, %v1250_v57  ;;  %v1222_v0 = vrot.slane %v1220_v38, 5 }
 0x156   : > { %v1572_v31 = vrot.slane %v1570_v29, 5  ;;  %v1598_v35 = vshll.u32 %v1501_v5, 16  ;;  %v874_v53 = vsel %vm2421_vm13, %v869_v30, %v873_v51  ;;  %v1218_v19 = vrot.slane %v1217_v3, 4 }
 0x157   : > { %v1568_v58 = vrot.slane %v1567_v1, 4  ;;  %v1595_v42 = vor.u32 %v1594_v32, %v1591_v17  ;;  %v1610_v59 = vrot.slane %v1609_v48, 4  ;;  %v1614_v7 = vrot.slane %v1612_v4, 5 }
 0x158   : > { %1260 = vrot.lane.b32.xlu0 %v1209_v2, %s2316_s25  ;;  %v1223_v41 = vsel %vm2421_vm13, %v1218_v19, %v1222_v0  ;;  %v1600_v40 = vrot.slane %v1598_v35, 5 }
 0x159   : > { %899 = vrot.lane.b32.xlu1 %v860_v14, %s2312_s19  ;;  %v1573_v22 = vsel %vm2421_vm13, %v1568_v58, %v1572_v31  ;;  %v1596_v25 = vrot.slane %v1595_v42, 4  ;;  %v1615_v63 = vsel %vm2421_vm13, %v1610_v59, %v1614_v7 }
 0x15b   : > { %v1601_v23 = vsel %vm2421_vm13, %v1596_v25, %v1600_v40 }
 0x15c   : > { %1414 = vrot.lane.b32.xlu0 %v1366_v11, %s2313_s20 }
 0x15d   : > { %1052 = vrot.lane.b32.xlu1 %v1015_v47, %s2315_s24 }
 0x160   : > { %901 = vrot.lane.b32.xlu0 %v874_v53, %s2312_s19 }
 0x161   : > { %1266 = vrot.lane.b32.xlu1 %v1251_v28, %s2316_s25 }
 0x164   : > { %1624 = vrot.lane.b32.xlu0 %v1573_v22, %s2317_s26 }
 0x165   : > { %1262 = vrot.lane.b32.xlu1 %v1223_v41, %s2316_s25 }
 0x166   : > { %v2831_v39 = vpop.permute.xlu0 %1095 }
 0x167   : > { %v732_v8 = vpop.permute.xlu1 %731 }
 0x168   : > { %753 = vst.msk [vmem:[#allocation3 + $0xc] sm:$0xf] %vm749_vm14, %v732_v8  ;;  %1628 = vrot.lane.b32.xlu0 %v1601_v23, %s2317_s26  ;;  %v1798_v8 = vld [vmem:[%s2981_s3] sm:$0x3] }
 0x169   : > { %1630 = vrot.lane.b32.xlu1 %v1615_v63, %s2317_s26  ;;  %2267 = vmatprep.subr.msk.bf16.mxu0 %vm1717_vm2, %v1798_v8  ;;  %v1820_v23 = vsel %vm1717_vm2, %v1798_v8, 0 }
 0x16a   : > { %v728_v50 = vpop.permute.xlu0 %727  ;;  %2222 = vmatpush3.bf16.msra.mxu0 %v1820_v23 }
 0x16b   : > { %v2838_v9 = vpop.permute.xlu1 %1457  ;;  %751 = vst.msk [vmem:[#allocation3 + $0x4] sm:$0xf] %vm749_vm14, %v728_v50  ;;  %v2125_v50 = vld [vmem:[%s2984_s6] ss:$0 sm:$0xff] }
 0x16e   : > { %v1092_v62 = vpop.permute.xlu0 %1091 }
 0x16f   : > { %v1098_v43 = vpop.permute.xlu1 %1097 }
 0x172   : > { %v2841_v12 = vpop.permute.xlu0 %1459 }
 0x173   : > { %v730_v37 = vpop.permute.xlu1 %729 }
 0x174   : > { %752 = vst.msk [vmem:[#allocation3 + $0x8] sm:$0xf] %vm749_vm14, %v730_v37 }
 0x176   : > { %v734_v36 = vpop.permute.xlu0 %733 }
 0x177   : > { %v1094_v49 = vpop.permute.xlu1 %1093  ;;  %754 = vst.msk [vmem:[#allocation3 + $0x10] sm:$0xf] %vm749_vm14, %v734_v36 }
 0x17a   : > { %v1456_v52 = vpop.permute.xlu0 %1455 }
 0x17b   : > { %v1409_v34 = vpop.permute.xlu1 %1408 }
 0x17e   : > { %v1047_v60 = vpop.permute.xlu0 %1046 }
 0x17f   : > { %v740_v56 = vpop.permute.xlu1 %739 }
 0x180   : > { %757 = vst.msk [vmem:[#allocation3 + $0x1c] sm:$0xf] %vm749_vm14, %v740_v56 }
 0x182   : > { %v1043_v2 = vpop.permute.xlu0 %1042 }
 0x183   : > { %v2846_v14 = vpop.permute.xlu1 %1465  ;;  %1067 = vst.msk [vmem:[#allocation3] sm:$0xf] %vm1066_vm3, %v1043_v2 }
 0x184   : > { %1116 = vst.msk [vmem:[#allocation3] sm:$0xf] %vm1115_vm4, %v1092_v62 }
 0x186   : > { %v2850_v61 = vpop.permute.xlu0 %1103 }
 0x187   : > { %v896_v21 = vpop.permute.xlu1 %895 }
 0x188   : > { %917 = vst.msk [vmem:[#allocation3 + $0xc] sm:$0xf] %vm913_vm15, %v896_v21 }
 0x18a   : > { %v1257_v20 = vpop.permute.xlu0 %1256 }
 0x18b   : > { %v1049_v55 = vpop.permute.xlu1 %1048 }
 0x18c   : > { %1070 = vst.msk [vmem:[#allocation3 + $0xc] sm:$0xf] %vm1066_vm3, %v1049_v55 }
 0x18d   : > { %1119 = vst.msk [vmem:[#allocation3 + $0xc] sm:$0xf] %vm1115_vm4, %v1098_v43 }
 0x18e   : > { %v1411_v15 = vpop.permute.xlu0 %1410 }
 0x18f   : > { %v1462_v10 = vpop.permute.xlu1 %1461 }
 0x192   : > { %v1100_v26 = vpop.permute.xlu0 %1099 }
 0x193   : > { %v1619_v6 = vpop.permute.xlu1 %1618 }
 0x196   : > { %v1253_v18 = vpop.permute.xlu0 %1252 }
 0x197   : > { %v736_v33 = vpop.permute.xlu1 %735  ;;  %1277 = vst.msk [vmem:[#allocation3] sm:$0xf] %vm1276_vm5, %v1253_v18 }
 0x198   : > { %755 = vst.msk [vmem:[#allocation3 + $0x14] sm:$0xf] %vm749_vm14, %v736_v33 }
 0x19a   : > { %v1407_v27 = vpop.permute.xlu0 %1406 }
 0x19b   : > { %v892_v24 = vpop.permute.xlu1 %891  ;;  %1431 = vst.msk [vmem:[#allocation3] sm:$0xf] %vm1430_vm6, %v1407_v27 }
 0x19c   : > { %915 = vst.msk [vmem:[#allocation3 + $0x4] sm:$0xf] %vm913_vm15, %v892_v24 }
 0x19d   : > { %1480 = vst.msk [vmem:[#allocation3] sm:$0xf] %vm1479_vm7, %v1456_v52 }
 0x19e   : > { %v2860_v38 = vpop.permute.xlu0 %1467 }
 0x19f   : > { %v1045_v57 = vpop.permute.xlu1 %1044 }
 0x1a0   : > { %1068 = vst.msk [vmem:[#allocation3 + $0x4] sm:$0xf] %vm1066_vm3, %v1045_v57 }
 0x1a1   : > { %1117 = vst.msk [vmem:[#allocation3 + $0x4] sm:$0xf] %vm1115_vm4, %v1094_v49 }
 0x1a2   : > { %v1621_v29 = vpop.permute.xlu0 %1620 }
 0x1a3   : > { %v1106_v51 = vpop.permute.xlu1 %1105 }
 0x1a6   : > { %v738_v46 = vpop.permute.xlu0 %737 }
 0x1a7   : > { %v1259_v13 = vpop.permute.xlu1 %1258  ;;  %756 = vst.msk [vmem:[#allocation3 + $0x18] sm:$0xf] %vm749_vm14, %v738_v46  ;;  %v2297_v46 = vld [vmem:[%s2389_s16] sm:$0xff]  }
 0x1a8   : > { %1280 = vst.msk [vmem:[#allocation3 + $0xc] sm:$0xf] %vm1276_vm5, %v1259_v13 }
 0x1aa   : > { %v898_v11 = vpop.permute.xlu0 %897 }
 0x1ab   : > { %v1102_v47 = vpop.permute.xlu1 %1101  ;;  %918 = vst.msk [vmem:[#allocation3 + $0x10] sm:$0xf] %vm913_vm15, %v898_v11  ;;  %v2299_v11 = vld [vmem:[%s2389_s16 + $0x10] sm:$0xff]  }
 0x1ae   : > { %v1464_v30 = vpop.permute.xlu0 %1463 }
 0x1af   : > { %v1255_v45 = vpop.permute.xlu1 %1254 }
 0x1b0   : > { %1278 = vst.msk [vmem:[#allocation3 + $0x4] sm:$0xf] %vm1276_vm5, %v1255_v45  ;;  %v2300_v45 = vld [vmem:[%s2389_s16 + $0x18] sm:$0xff]  }
 0x1b1   : > { %1432 = vst.msk [vmem:[#allocation3 + $0x4] sm:$0xf] %vm1430_vm6, %v1409_v34 }
 0x1b2   : > { %1481 = vst.msk [vmem:[#allocation3 + $0x4] sm:$0xf] %vm1479_vm7, %v2838_v9  ;;  %v894_v3 = vpop.permute.xlu0 %893  ;;  %v1887_v9 = vld [vmem:[%s2982_s4] sm:$0xf] }
 0x1b3   : > { %1642 = vst.msk [vmem:[#allocation3 + $0x4] sm:$0xf] %vm1640_vm8, %v1619_v6  ;;  %v1417_v16 = vpop.permute.xlu1 %1416  ;;  %2268 = vmatprep.subr.msk.bf16.mxu0 %vm454_vm0, %v1887_v9  ;;  %v1896_v55 = vsel %vm454_vm0, %v1887_v9, 0  ;;  %vm2011_vm0 = vcmask 125952  }
 0x1b4   : > { %916 = vst.msk [vmem:[#allocation3 + $0x8] sm:$0xf] %vm913_vm15, %v894_v3 }
 0x1b5   : > { %1069 = vst.msk [vmem:[#allocation3 + $0x8] sm:$0xf] %vm1066_vm3, %v1047_v60 }
 0x1b6   : > { %1118 = vst.msk [vmem:[#allocation3 + $0x8] sm:$0xf] %vm1115_vm4, %v2831_v39  ;;  %v1617_v5 = vpop.permute.xlu0 %1616 }
 0x1b7   : > { %1279 = vst.msk [vmem:[#allocation3 + $0x8] sm:$0xf] %vm1276_vm5, %v1257_v20  ;;  %v1413_v1 = vpop.permute.xlu1 %1412 }
 0x1b8   : > { %1433 = vst.msk [vmem:[#allocation3 + $0x8] sm:$0xf] %vm1430_vm6, %v1411_v15  ;;  %1434 = vst.msk [vmem:[#allocation3 + $0xc] sm:$0xf] %vm1430_vm6, %v1413_v1 }
 0x1b9   : > { %1641 = vst.msk [vmem:[#allocation3] sm:$0xf] %vm1640_vm8, %v1617_v5 }
 0x1ba   : > { %1482 = vst.msk [vmem:[#allocation3 + $0x8] sm:$0xf] %vm1479_vm7, %v2841_v12  ;;  %1483 = vst.msk [vmem:[#allocation3 + $0xc] sm:$0xf] %vm1479_vm7, %v1462_v10  ;;  %v1055_v32 = vpop.permute.xlu0 %1054 }
 0x1bb   : > { %1643 = vst.msk [vmem:[#allocation3 + $0x8] sm:$0xf] %vm1640_vm8, %v1621_v29  ;;  %v904_v17 = vpop.permute.xlu1 %903 }
 0x1bc   : > { %921 = vst.msk [vmem:[#allocation3 + $0x1c] sm:$0xf] %vm913_vm15, %v904_v17 }
 0x1be   : > { %v1051_v4 = vpop.permute.xlu0 %1050 }
 0x1bf   : > { %v1057_v48 = vpop.permute.xlu1 %1056  ;;  %1071 = vst.msk [vmem:[#allocation3 + $0x10] sm:$0xf] %vm1066_vm3, %v1051_v4 }
 0x1c0   : > { %v2290_v28 = vld [vmem:[#allocation3] sm:$0xff]   ;;  %1074 = vst.msk [vmem:[#allocation3 + $0x1c] sm:$0xf] %vm1066_vm3, %v1057_v48 }
 0x1c1   : > { %1123 = vst.msk [vmem:[#allocation3 + $0x1c] sm:$0xf] %vm1115_vm4, %v1106_v51  ;;  %1120 = vst.msk [vmem:[#allocation3 + $0x10] sm:$0xf] %vm1115_vm4, %v1100_v26  ;;  %2213 = vmatprep.mubr.msk.bf16.mxu1 %vm1704_vm9, %v2290_v28 }
 0x1c2   : > { %v1265_v31 = vpop.permute.xlu0 %1264 }
 0x1c3   : > { %v1627_v0 = vpop.permute.xlu1 %1626 }
 0x1c6   : > { %v1419_v53 = vpop.permute.xlu0 %1418 }
 0x1c7   : > { %v1623_v35 = vpop.permute.xlu1 %1622 }
 0x1c8   : > { %1644 = vst.msk [vmem:[#allocation3 + $0xc] sm:$0xf] %vm1640_vm8, %v1623_v35 }
 0x1ca   : > { %v1261_v58 = vpop.permute.xlu0 %1260 }
 0x1cb   : > { %v900_v19 = vpop.permute.xlu1 %899  ;;  %1281 = vst.msk [vmem:[#allocation3 + $0x10] sm:$0xf] %vm1276_vm5, %v1261_v58 }
 0x1cc   : > { %919 = vst.msk [vmem:[#allocation3 + $0x14] sm:$0xf] %vm913_vm15, %v900_v19 }
 0x1ce   : > { %v1415_v59 = vpop.permute.xlu0 %1414 }
 0x1cf   : > { %v1053_v42 = vpop.permute.xlu1 %1052  ;;  %v2294_v7 = vld [vmem:[#allocation3 + $0x8] sm:$0xff]   ;;  %1435 = vst.msk [vmem:[#allocation3 + $0x10] sm:$0xf] %vm1430_vm6, %v1415_v59 }
 0x1d0   : > { %1072 = vst.msk [vmem:[#allocation3 + $0x14] sm:$0xf] %vm1066_vm3, %v1053_v42  ;;  %2214 = vmatmul.mubr.msk.bf16.vlgmr.msra.gmra.mrb[8].mxu1 %vm1704_vm9, %v2294_v7 }
 0x1d1   : > { %1121 = vst.msk [vmem:[#allocation3 + $0x14] sm:$0xf] %vm1115_vm4, %v1102_v47  ;;  %v2298_v47 = vld [vmem:[%s2389_s16 + $0x8] sm:$0xff]  }
 0x1d2   : > { %1484 = vst.msk [vmem:[#allocation3 + $0x10] sm:$0xf] %vm1479_vm7, %v1464_v30  ;;  %v902_v22 = vpop.permute.xlu0 %901  ;;  %v2137_v30 = vld [vmem:[%s2985_s7] ss:$0 sm:$0xff] }
 0x1d3   : > { %v1267_v41 = vpop.permute.xlu1 %1266  ;;  %920 = vst.msk [vmem:[#allocation3 + $0x18] sm:$0xf] %vm913_vm15, %v902_v22 }
 0x1d4   : > { %1284 = vst.msk [vmem:[#allocation3 + $0x1c] sm:$0xf] %vm1276_vm5, %v1267_v41 }
 0x1d5   : > { %1438 = vst.msk [vmem:[#allocation3 + $0x1c] sm:$0xf] %vm1430_vm6, %v2821_v54 }
 0x1d6   : > { %1073 = vst.msk [vmem:[#allocation3 + $0x18] sm:$0xf] %vm1066_vm3, %v1055_v32  ;;  %v1625_v40 = vpop.permute.xlu0 %1624 }
 0x1d7   : > { %1487 = vst.msk [vmem:[#allocation3 + $0x1c] sm:$0xf] %vm1479_vm7, %v2811_v44  ;;  %v1263_v25 = vpop.permute.xlu1 %1262 }
 0x1d8   : > { %1122 = vst.msk [vmem:[#allocation3 + $0x18] sm:$0xf] %vm1115_vm4, %v2850_v61 }
 0x1d9   : > { %1283 = vst.msk [vmem:[#allocation3 + $0x18] sm:$0xf] %vm1276_vm5, %v1265_v31  ;;  %1282 = vst.msk [vmem:[#allocation3 + $0x14] sm:$0xf] %vm1276_vm5, %v1263_v25 }
 0x1da   : > { %1437 = vst.msk [vmem:[#allocation3 + $0x18] sm:$0xf] %vm1430_vm6, %v1419_v53  ;;  %1436 = vst.msk [vmem:[#allocation3 + $0x14] sm:$0xf] %vm1430_vm6, %v1417_v16  ;;  %v1629_v54 = vpop.permute.xlu0 %1628  ;;  %v2142_v16 = vld [vmem:[%s2986_s8] ss:$0 sm:$0xff] }
 0x1db   : > { %1645 = vst.msk [vmem:[#allocation3 + $0x10] sm:$0xf] %vm1640_vm8, %v1625_v40  ;;  %v1631_v44 = vpop.permute.xlu1 %1630  ;;  %v2247_v3 = vadd.f32 %v2142_v16, %v2137_v30 }
 0x1dc   : > { %1486 = vst.msk [vmem:[#allocation3 + $0x18] sm:$0xf] %vm1479_vm7, %v2860_v38  ;;  %1485 = vst.msk [vmem:[#allocation3 + $0x14] sm:$0xf] %vm1479_vm7, %v2846_v14 }
 0x1dd   : > { %1646 = vst.msk [vmem:[#allocation3 + $0x14] sm:$0xf] %vm1640_vm8, %v1627_v0  ;;  %1648 = vst.msk [vmem:[#allocation3 + $0x1c] sm:$0xf] %vm1640_vm8, %v1631_v44 }
 0x1de   : > { %1647 = vst.msk [vmem:[#allocation3 + $0x18] sm:$0xf] %vm1640_vm8, %v1629_v54 }
 0x1e4   : > { %v2295_v63 = vld [vmem:[#allocation3 + $0x10] sm:$0xff]  }
 0x1e5   : > { %v2296_v39 = vld [vmem:[#allocation3 + $0x18] sm:$0xff]   ;;  %2217 = vmatprep.mubr.msk.bf16.mxu1 %vm1704_vm9, %v2295_v63 }
 0x1e6   : > { %2218 = vmatmul.mubr.msk.bf16.gmra.mrb[12].mxu1 %vm1704_vm9, %v2296_v39 }
 0x2a3   : > { %v2215_v43 = vpop.f32.mrb[8].mxu1 }
 0x2a4   : > { %v1764_v62 = vadd.f32 %v2215_v43, %v2125_v50  ;;  %v1755_v37 = vpop.f32.mrb[9].mxu1 }
 0x2a5   : > { %v1756_v12 = vadd.f32 %v2125_v50, %v1755_v37  ;;  %v2216_v49 = vpop.f32.mrb[10].mxu1 }
 0x2a6   : > { %v1767_v36 = vadd.f32 %v2216_v49, %v2125_v50  ;;  %v1758_v34 = vpop.f32.mrb[11].mxu1  ;;  %v1788_v56 = vmax.f32 %v1764_v62, 0.0 }
 0x2a7   : > { %v1759_v52 = vadd.f32 %v2125_v50, %v1758_v34  ;;  %v1786_v14 = vmax.f32 %v1756_v12, 0.0 }
 0x2a8   : > { %v1789_v60 = vmax.f32 %v1767_v36, 0.0 }
 0x2a9   : > { %v1787_v2 = vmax.f32 %v1759_v52, 0.0 }
 0x2aa   : > { %v1795_v21 = vpack.c.bf16 %v1789_v60, %v1788_v56 }
 0x2ab   : > { %v1794_v61 = vpack.c.bf16 %v1787_v2, %v1786_v14 }
 0x2ad   : > { %2223 = vmatprep.mubr.msk.bf16.mxu0 %vm1806_vm10, %v1794_v61 }
 0x2ae   : > { %2224 = vmatmul.mubr.msk.bf16.vlgmr.msra.gmra.mrb[0].mxu0 %vm1806_vm10, %v1795_v21 }
 0x2af   : > { %2232 = vmatpush3.bf16.msra.mxu0 %v1896_v55 }
 0x2b9   : > { %v2219_v20 = vpop.f32.mrb[12].mxu1 }
 0x2ba   : > { %v1780_v10 = vadd.f32 %v2219_v20, %v2125_v50  ;;  %v1771_v15 = vpop.f32.mrb[13].mxu1 }
 0x2bb   : > { %v1772_v6 = vadd.f32 %v2125_v50, %v1771_v15  ;;  %v2220_v26 = vpop.f32.mrb[14].mxu1 }
 0x2bc   : > { %v1783_v33 = vadd.f32 %v2220_v26, %v2125_v50  ;;  %v1774_v18 = vpop.f32.mrb[15].mxu1  ;;  %v1792_v27 = vmax.f32 %v1780_v10, 0.0 }
 0x2bd   : > { %v1775_v24 = vadd.f32 %v2125_v50, %v1774_v18  ;;  %v1790_v38 = vmax.f32 %v1772_v6, 0.0 }
 0x2be   : > { %v1793_v57 = vmax.f32 %v1783_v33, 0.0 }
 0x2bf   : > { %v1791_v51 = vmax.f32 %v1775_v24, 0.0 }
 0x2c0   : > { %v1797_v29 = vpack.c.bf16 %v1793_v57, %v1792_v27 }
 0x2c1   : > { %v1796_v13 = vpack.c.bf16 %v1791_v51, %v1790_v38 }
 0x2c3   : > { %2227 = vmatprep.mubr.msk.bf16.mxu0 %vm1806_vm10, %v1796_v13 }
 0x2c4   : > { %2228 = vmatmul.mubr.msk.bf16.gmra.mrb[4].mxu0 %vm1806_vm10, %v1797_v29 }
 0x2c5   : > { %2233 = vmatprep.mubr.msk.bf16.mxu0 %vm441_vm1, %v2297_v46 }
 0x2cc   : > { %2234 = vmatmul.mubr.msk.bf16.vlgmr.msra.gmra.mrb[0].mxu0 %vm441_vm1, %v2298_v47 }
 0x2cd   : > { %2237 = vmatprep.mubr.msk.bf16.mxu0 %vm441_vm1, %v2299_v11 }
 0x2d4   : > { %2238 = vmatmul.mubr.msk.bf16.gmra.mrb[4].mxu0 %vm441_vm1, %v2300_v45 }
 0x39f   : > { %v2235_v1 = vpop.f32.mrb[0].mxu0 }
 0x3a0   : > { %v2241_v5 = vadd.f32 %v2235_v1, %v2137_v30  ;;  %v1932_v17 = vpop.f32.mrb[1].mxu0 }
 0x3a1   : > { %v2243_v32 = vadd.f32 %v2137_v30, %v1932_v17  ;;  %v2236_v48 = vpop.f32.mrb[2].mxu0 }
 0x3a2   : > { %v2242_v4 = vadd.f32 %v2241_v5, %v2142_v16  ;;  %v2246_v28 = vadd.f32 %v2247_v3, %v2236_v48  ;;  %v1935_v0 = vpop.f32.mrb[3].mxu0 }
 0x3a3   : > { %v2244_v31 = vadd.f32 %v2243_v32, %v2142_v16  ;;  %v2248_v35 = vadd.f32 %v2247_v3, %v1935_v0 }
 0x3a4   : > { %v1973_v53 = vmax.f32 %v2242_v4, 0.0  ;;  %v1974_v19 = vmax.f32 %v2246_v28, 0.0 }
 0x3a5   : > { %v1971_v58 = vmax.f32 %v2244_v31, 0.0  ;;  %v1972_v42 = vmax.f32 %v2248_v35, 0.0 }
 0x3a6   : > { %v2169_v59 = vpack.c.bf16 %v1973_v53, %v1973_v53  ;;  %v2170_v7 = vpack.c.bf16 %v1974_v19, %v1974_v19 }
 0x3a7   : > { %v2167_v41 = vpack.c.bf16 %v1971_v58, %v1971_v58  ;;  %v2168_v22 = vpack.c.bf16 %v1972_v42, %v1972_v42  ;;  %v2239_v25 = vpop.f32.mrb[4].mxu0 }
 0x3a8   : > { %2014 = vst.msk [vmem:[%s2957_s27 + $0x8] sm:$0xf] %vm2011_vm0, %v2169_v59  ;;  %2015 = vst.msk [vmem:[%s2957_s27 + $0xc] sm:$0xf] %vm2011_vm0, %v2170_v7  ;;  %v2250_v40 = vadd.f32 %v2247_v3, %v2239_v25  ;;  %v1948_v44 = vpop.f32.mrb[5].mxu0 }
 0x3a9   : > { %2012 = vst.msk [vmem:[%s2957_s27] sm:$0xf] %vm2011_vm0, %v2167_v41  ;;  %2013 = vst.msk [vmem:[%s2957_s27 + $0x4] sm:$0xf] %vm2011_vm0, %v2168_v22  ;;  %v2252_v54 = vadd.f32 %v2247_v3, %v1948_v44  ;;  %v2240_v63 = vpop.f32.mrb[6].mxu0 }
 0x3aa   : > { %v1977_v39 = vmax.f32 %v2250_v40, 0.0  ;;  %v2254_v8 = vadd.f32 %v2247_v3, %v2240_v63  ;;  %v1951_v23 = vpop.f32.mrb[7].mxu0 }
 0x3ab   : > { %v1975_v9 = vmax.f32 %v2252_v54, 0.0  ;;  %v2256_v50 = vadd.f32 %v2247_v3, %v1951_v23 }
 0x3ac   : > { %v2173_v43 = vpack.c.bf16 %v1977_v39, %v1977_v39  ;;  %v1978_v62 = vmax.f32 %v2254_v8, 0.0 }
 0x3ad   : > { %v2171_v37 = vpack.c.bf16 %v1975_v9, %v1975_v9  ;;  %v1976_v12 = vmax.f32 %v2256_v50, 0.0 }
 0x3ae   : > { %2018 = vst.msk [vmem:[%s2957_s27 + $0x18] sm:$0xf] %vm2011_vm0, %v2173_v43  ;;  %v2174_v49 = vpack.c.bf16 %v1978_v62, %v1978_v62 }
 0x3af   : > { %2016 = vst.msk [vmem:[%s2957_s27 + $0x10] sm:$0xf] %vm2011_vm0, %v2171_v37  ;;  %v2172_v36 = vpack.c.bf16 %v1976_v12, %v1976_v12 }
 0x3b0   : > { %2019 = vst.msk [vmem:[%s2957_s27 + $0x1c] sm:$0xf] %vm2011_vm0, %v2174_v49 }
 0x3b1   : > { %2017 = vst.msk [vmem:[%s2957_s27 + $0x14] sm:$0xf] %vm2011_vm0, %v2172_v36 }
 0x3b2 PF: > { %s19_s30 = sadd.s32 1, %s2307_s30  }
 0x3b3   : > { %p16_p4 = scmp.ge.s32.totalorder %s19_s30, 4  }
 0x3b5   :  { %18 = sbr.rel (!%p16_p4) target bundleno = 1 (0x1), region = 89 }

</bundles_post_ra>
